<compile_context>
chip_gen: v5e
topology: v5e:2x2
jax: 0.10.0
libtpu: 0.0.40
codegen_flags: <defaults>
</compile_context>

<pallas_src>
import functools

import jax
import jax.numpy as jnp
from jax.experimental import pallas as pl
from jax.experimental.pallas import tpu as pltpu


def _sum3(x):
    """Sum a (3, L) array over its 3 rows -> (1, L) using plain VPU adds."""
    return x[0:1, :] + x[1:2, :] + x[2:3, :]


def _loss_kernel(pc_nl_ref, pc_q_ref, flowa_ref, gt_ref, data_ref, smooth_ref,
                 *, k_nn, radius, tq):
    """One (batch, query-tile) grid step.

    pc_nl_ref  : (1, N, 3)  channels-last full point set  (neighbour columns)
    pc_q_ref   : (1, 3, Tq) channels-first query points   (query rows)
    flowa_ref  : (1, 4, N)  [ones ; flow] channels-first  (gather LHS)
    gt_ref     : (1, 3, Tq) channels-first gt flow tile
    data_ref   : (1, 1, Tq) per-point sum_c |pred - gt|             (lane-dense)
    smooth_ref : (1, 1, Tq) per-point mean_k ||flow_i - flow_nn||_1 (lane-dense)
    """
    qoff = pl.multiple_of(pl.program_id(1) * tq, tq)

    pc_nl = pc_nl_ref[0]                               # (N, 3)
    pc_q = pc_q_ref[0]                                 # (3, Tq)
    stacked = flowa_ref[0]                             # (4, N)  [ones; flow]
    flow_q = flowa_ref[0, 1:4, pl.ds(qoff, tq)]        # (3, Tq)
    gt_q = gt_ref[0]                                   # (3, Tq)

    # ---- L1 data term, per point (lane-dense row store) ----------------------
    data_ref[0] = _sum3(jnp.abs(flow_q - gt_q))        # (1, Tq)

    # ---- exact squared distances: neighbours on sublanes, queries on lanes ---
    t0 = pc_nl[:, 0:1] - pc_q[0:1, :]                  # (N, Tq)
    t1 = pc_nl[:, 1:2] - pc_q[1:2, :]
    t2 = pc_nl[:, 2:3] - pc_q[2:3, :]
    d = t0 * t0 + t1 * t1 + t2 * t2                    # (N, Tq), exact

    acc = jnp.zeros((1, tq), jnp.float32)
    big = jnp.float32(1e30)
    one = jnp.float32(1.0)
    zero = jnp.float32(0.0)

    # k_nn is tiny (e.g. 4); only d / acc are carried across iterations so the
    # static unrolled loop keeps live vreg state small.
    for _ in range(k_nn):
        # single reduction per selected neighbour; dmin is lane-dense (1, Tq)
        dmin = jnp.min(d, axis=0, keepdims=True)       # exact min sq. distance
        eq = d == dmin                                 # (N, Tq)
        onehot = jnp.where(eq, one, zero)              # (N, Tq) f32
        # ONE MXU matmul: row 0 -> tie count, rows 1..3 -> gathered flow sum
        g = jax.lax.dot_general(stacked, onehot, (((1,), (0,)), ((), ())),
                                preferred_element_type=jnp.float32)   # (4, Tq)
        inv = one / g[0:1, :]                          # exactly 1.0 when unique
        nn_flow = g[1:4, :] * inv                      # (3, Tq)
        l1 = _sum3(jnp.abs(flow_q - nn_flow))          # (1, Tq)
        # NOTE: like the reference, the SQUARED distance is compared to radius.
        acc = acc + jnp.where(dmin <= radius, l1, zero)
        d = jnp.where(eq, big, d)                      # mask selected neighbour(s)

    smooth_ref[0] = acc * jnp.float32(1.0 / k_nn)      # mean over k, (1, Tq)


def _vmem_capacity_bytes():
    try:
        return int(pltpu.get_tpu_info().vmem_capacity_bytes)
    except Exception:
        return 64 * 1024 * 1024          # assume the smallest (v7x: 64 MiB)


def _vmem_usage_bytes(tq, n):
    big = 3 * tq * n * 4                 # d, onehot, one streaming (N, Tq) temp
    pc_nl = 2 * n * 128 * 4              # double-buffered (N, 3->128 lanes) block
    flow = 2 * 8 * n * 4                 # double-buffered (4->8, N) augmented flow
    tiles = 8 * 2 * 8 * tq * 4           # query pc / gt tiles + both outputs (generous)
    return big + pc_nl + flow + tiles


def _pick_tq(n):
    """Largest query tile whose live VMEM footprint fits the device."""
    budget = _vmem_capacity_bytes() - (16 << 20)       # compiler headroom
    cands = [t for t in (1024, 512, 256, 128) if t <= n and n % t == 0]
    for tq in cands:
        if _vmem_usage_bytes(tq, n) <= budget:
            return tq
    return cands[-1] if cands else n     # small / irregular N: one tile


def _vmem_limit_bytes(tq, n):
    cap = _vmem_capacity_bytes()
    est = _vmem_usage_bytes(tq, n) + (8 << 20)
    return int(min(cap - (2 << 20), max(32 << 20, est)))


def _run_loss_kernel(pc_source, pred_flow, gt_flow, *, k_nn, radius, tq=None):
    B, N, C = pc_source.shape
    assert C == 3, "point tensors must be (B, N, 3)"
    if tq is None:
        tq = _pick_tq(N)
    assert N % tq == 0 and (tq == N or tq % 128 == 0), (N, tq)
    nq = N // tq

    f32 = jnp.float32
    pc_nl = pc_source.astype(f32)                               # (B, N, 3)
    pc_cf = jnp.transpose(pc_source, (0, 2, 1)).astype(f32)     # (B, 3, N)
    flow_cf = jnp.transpose(pred_flow, (0, 2, 1)).astype(f32)   # (B, 3, N)
    gt_cf = jnp.transpose(gt_flow, (0, 2, 1)).astype(f32)       # (B, 3, N)
    flow_aug = jnp.concatenate(
        [jnp.ones((B, 1, N), f32), flow_cf], axis=1)            # (B, 4, N)

    kernel = functools.partial(_loss_kernel, k_nn=k_nn, radius=radius, tq=tq)
    data_pp, smooth_pp = pl.pallas_call(
        kernel,
        out_shape=(
            jax.ShapeDtypeStruct((B, 1, N), f32),
            jax.ShapeDtypeStruct((B, 1, N), f32),
        ),
        grid=(B, nq),
        in_specs=[
            pl.BlockSpec((1, N, 3), lambda b, q: (b, 0, 0)),    # pc, channels-last full
            pl.BlockSpec((1, 3, tq), lambda b, q: (b, 0, q)),   # pc query tile, chan-first
            pl.BlockSpec((1, 4, N), lambda b, q: (b, 0, 0)),    # [ones; flow], chan-first
            pl.BlockSpec((1, 3, tq), lambda b, q: (b, 0, q)),   # gt tile, chan-first
        ],
        out_specs=(
            pl.BlockSpec((1, 1, tq), lambda b, q: (b, 0, q)),
            pl.BlockSpec((1, 1, tq), lambda b, q: (b, 0, q)),
        ),
        compiler_params=pltpu.CompilerParams(
            dimension_semantics=("parallel", "parallel"),
            vmem_limit_bytes=_vmem_limit_bytes(tq, N),
        ),
    )(pc_nl, pc_cf, flow_aug, gt_cf)
    return data_pp, smooth_pp


class SupervisedL1RegLoss:
    """JAX/Pallas port of losses/flow_loss_sup.py::SupervisedL1RegLoss."""

    def __init__(self, w_data, w_smoothness, smoothness_loss_params, **kwargs):
        self.w_data = w_data
        self.w_smoothness = w_smoothness
        self.w_knn = smoothness_loss_params.get("w_knn", 1.0)
        self.w_ball_q = smoothness_loss_params.get("w_ball_q", 0.0)
        knn_params = smoothness_loss_params["knn_loss_params"]
        self.k = knn_params["k"]
        self.radius = knn_params["radius"]
        assert knn_params.get("loss_norm", 1) == 1, "only loss_norm=1 implemented"
        # TODO(synk): ball-query smoothness term (BallQLoss) not implemented; w_ball_q must be 0.
        assert self.w_ball_q == 0.0

    def __call__(self, pc_source, pc_target, pred_flow, gt_flow, i=0):
        if len(self.w_data) == 1:
            w_data, w_smooth = self.w_data[0], self.w_smoothness[0]
        else:
            w_data, w_smooth = self.w_data[i], self.w_smoothness[i]

        data_pp, smooth_pp = _run_loss_kernel(
            pc_source, pred_flow, gt_flow, k_nn=self.k, radius=self.radius
        )
        B, N, C = pred_flow.shape
        data_loss = jnp.sum(data_pp) / (B * N * C)   # == mean(|pred - gt|)
        smooth_loss = jnp.mean(smooth_pp)            # mean over batch & points
        return w_data * data_loss + w_smooth * (self.w_knn * smooth_loss)


def _reference_loss(pc_source, pred_flow, gt_flow, w_data, w_smooth, k, radius, w_knn):
    """Pure-JAX reference for validation."""
    data = jnp.mean(jnp.abs(pred_flow - gt_flow))
    d = jnp.sum((pc_source[:, :, None, :] - pc_source[:, None, :, :]) ** 2, axis=-1)
    neg_vals, idx = jax.lax.top_k(-d, k)                      # (B, N, k)
    ndist = -neg_vals
    nn_flow = jax.vmap(lambda f, ix: f[ix])(pred_flow, idx)   # (B, N, k, 3)
    l1 = jnp.sum(jnp.abs(pred_flow[:, :, None, :] - nn_flow), axis=-1)  # (B, N, k)
    l1 = jnp.where(ndist <= radius, l1, 0.0)
    smooth = jnp.mean(jnp.mean(l1, axis=-1))
    return w_data * data + w_smooth * w_knn * smooth


if __name__ == "__main__":
    key = jax.random.PRNGKey(0)
    B, N = 2, 128
    k1, k2, k3, k4, k5, k6, k7 = jax.random.split(key, 7)
    pc_source = jax.random.normal(k1, (B, N, 3), jnp.float32)
    pc_target = jax.random.normal(k2, (B, N, 3), jnp.float32)  # unused by this loss
    pred_flow = 0.1 * jax.random.normal(k3, (B, N, 3), jnp.float32)
    gt_flow = 0.1 * jax.random.normal(k4, (B, N, 3), jnp.float32)

    smoothness_loss_params = {
        "w_knn": 1.0,
        "w_ball_q": 0.0,
        "knn_loss_params": {"k": 4, "radius": 100.0, "loss_norm": 1},
    }
    loss_fn = SupervisedL1RegLoss(
        w_data=[0.75], w_smoothness=[0.25], smoothness_loss_params=smoothness_loss_params
    )

    # --- test 1: module wrapper, single query tile ---------------------------
    loss = loss_fn(pc_source, pc_target, pred_flow, gt_flow, i=0)
    loss = jax.block_until_ready(loss)
    ref = _reference_loss(
        pc_source, pred_flow, gt_flow,
        w_data=0.75, w_smooth=0.25, k=4, radius=100.0, w_knn=1.0,
    )
    assert jnp.allclose(loss, ref, rtol=1e-5, atol=1e-5), (loss, ref)

    # --- test 2: exercise the tiled query path (grid = (2, 2), Tq=128) -------
    N2 = 256
    pc2 = jax.random.normal(k5, (B, N2, 3), jnp.float32)
    fl2 = 0.1 * jax.random.normal(k6, (B, N2, 3), jnp.float32)
    gt2 = 0.1 * jax.random.normal(k7, (B, N2, 3), jnp.float32)
    d_pp, s_pp = _run_loss_kernel(pc2, fl2, gt2, k_nn=4, radius=100.0, tq=128)
    loss2 = 0.75 * (jnp.sum(d_pp) / (B * N2 * 3)) + 0.25 * jnp.mean(s_pp)
    loss2 = jax.block_until_ready(loss2)
    ref2 = _reference_loss(
        pc2, fl2, gt2, w_data=0.75, w_smooth=0.25, k=4, radius=100.0, w_knn=1.0,
    )
    assert jnp.allclose(loss2, ref2, rtol=1e-5, atol=1e-5), (loss2, ref2)

    print("KERNEL_OK")
</pallas_src>

<mosaic_0001>
module attributes {stable_mosaic.version = 11 : i64} {
  func.func @_loss_kernel(%arg0: i32, %arg1: i32, %arg2: memref<1x128x3xf32, #tpu.memory_space<vmem>>, %arg3: memref<1x3x128xf32, #tpu.memory_space<vmem>>, %arg4: memref<1x4x128xf32, #tpu.memory_space<vmem>>, %arg5: memref<1x3x128xf32, #tpu.memory_space<vmem>>, %arg6: memref<1x1x128xf32, #tpu.memory_space<vmem>>, %arg7: memref<1x1x128xf32, #tpu.memory_space<vmem>>) attributes {dimension_semantics = [#tpu.dimension_semantics<parallel>, #tpu.dimension_semantics<parallel>], iteration_bounds = array<i64: 2, 1>, scalar_prefetch = 0 : i64, scratch_operands = 0 : i64, tpu.core_type = #tpu.core_type<tc>, window_params = [{transform_indices = @transform_0, window_bounds = array<i64: 1, 128, 3>}, {transform_indices = @transform_1, window_bounds = array<i64: 1, 3, 128>}, {transform_indices = @transform_2, window_bounds = array<i64: 1, 4, 128>}, {transform_indices = @transform_3, window_bounds = array<i64: 1, 3, 128>}, {transform_indices = @transform_4, window_bounds = array<i64: 1, 1, 128>}, {transform_indices = @transform_5, window_bounds = array<i64: 1, 1, 128>}]} {
    %c128_i32 = arith.constant 128 : i32
    %0 = arith.muli %arg1, %c128_i32 : i32
    %1 = tpu.assume_multiple %0, 128 : i32
    %c0 = arith.constant 0 : index
    %c0_0 = arith.constant 0 : index
    %c0_1 = arith.constant 0 : index
    %2 = vector.load %arg2[%c0, %c0_0, %c0_1] : memref<1x128x3xf32, #tpu.memory_space<vmem>>, vector<1x128x3xf32>
    %3 = vector.shape_cast %2 : vector<1x128x3xf32> to vector<128x3xf32>
    %c0_2 = arith.constant 0 : index
    %c0_3 = arith.constant 0 : index
    %c0_4 = arith.constant 0 : index
    %4 = vector.load %arg3[%c0_2, %c0_3, %c0_4] : memref<1x3x128xf32, #tpu.memory_space<vmem>>, vector<1x3x128xf32>
    %5 = vector.shape_cast %4 : vector<1x3x128xf32> to vector<3x128xf32>
    %c0_5 = arith.constant 0 : index
    %c0_6 = arith.constant 0 : index
    %c0_7 = arith.constant 0 : index
    %6 = vector.load %arg4[%c0_5, %c0_6, %c0_7] : memref<1x4x128xf32, #tpu.memory_space<vmem>>, vector<1x4x128xf32>
    %7 = vector.shape_cast %6 : vector<1x4x128xf32> to vector<4x128xf32>
    %c0_8 = arith.constant 0 : index
    %c1 = arith.constant 1 : index
    %8 = arith.index_cast %1 : i32 to index
    %9 = vector.load %arg4[%c0_8, %c1, %8] : memref<1x4x128xf32, #tpu.memory_space<vmem>>, vector<1x3x128xf32>
    %10 = vector.shape_cast %9 : vector<1x3x128xf32> to vector<3x128xf32>
    %c0_9 = arith.constant 0 : index
    %c0_10 = arith.constant 0 : index
    %c0_11 = arith.constant 0 : index
    %11 = vector.load %arg5[%c0_9, %c0_10, %c0_11] : memref<1x3x128xf32, #tpu.memory_space<vmem>>, vector<1x3x128xf32>
    %12 = vector.shape_cast %11 : vector<1x3x128xf32> to vector<3x128xf32>
    %13 = arith.subf %10, %12 : vector<3x128xf32>
    %14 = math.absf %13 : vector<3x128xf32>
    %15 = vector.extract_strided_slice %14 {offsets = [0, 0], sizes = [1, 128], strides = [1, 1]} : vector<3x128xf32> to vector<1x128xf32>
    %16 = vector.extract_strided_slice %14 {offsets = [1, 0], sizes = [1, 128], strides = [1, 1]} : vector<3x128xf32> to vector<1x128xf32>
    %17 = arith.addf %15, %16 : vector<1x128xf32>
    %18 = vector.extract_strided_slice %14 {offsets = [2, 0], sizes = [1, 128], strides = [1, 1]} : vector<3x128xf32> to vector<1x128xf32>
    %19 = arith.addf %17, %18 : vector<1x128xf32>
    %c0_12 = arith.constant 0 : index
    %c0_13 = arith.constant 0 : index
    %c0_14 = arith.constant 0 : index
    %20 = vector.load %arg6[%c0_12, %c0_13, %c0_14] : memref<1x1x128xf32, #tpu.memory_space<vmem>>, vector<1x1x128xf32>
    %21 = vector.shape_cast %20 : vector<1x1x128xf32> to vector<1x128xf32>
    %22 = vector.shape_cast %19 : vector<1x128xf32> to vector<1x1x128xf32>
    tpu.vector_store %arg6[%c0_12, %c0_13, %c0_14], %22 {strides = array<i32>} : memref<1x1x128xf32, #tpu.memory_space<vmem>>, vector<1x1x128xf32>,
    %23 = vector.extract_strided_slice %3 {offsets = [0, 0], sizes = [128, 1], strides = [1, 1]} : vector<128x3xf32> to vector<128x1xf32>
    %24 = vector.extract_strided_slice %5 {offsets = [0, 0], sizes = [1, 128], strides = [1, 1]} : vector<3x128xf32> to vector<1x128xf32>
    %25 = vector.broadcast %23 : vector<128x1xf32> to vector<128x128xf32>
    %26 = vector.broadcast %24 : vector<1x128xf32> to vector<128x128xf32>
    %27 = arith.subf %25, %26 : vector<128x128xf32>
    %28 = vector.extract_strided_slice %3 {offsets = [0, 1], sizes = [128, 1], strides = [1, 1]} : vector<128x3xf32> to vector<128x1xf32>
    %29 = vector.extract_strided_slice %5 {offsets = [1, 0], sizes = [1, 128], strides = [1, 1]} : vector<3x128xf32> to vector<1x128xf32>
    %30 = vector.broadcast %28 : vector<128x1xf32> to vector<128x128xf32>
    %31 = vector.broadcast %29 : vector<1x128xf32> to vector<128x128xf32>
    %32 = arith.subf %30, %31 : vector<128x128xf32>
    %33 = vector.extract_strided_slice %3 {offsets = [0, 2], sizes = [128, 1], strides = [1, 1]} : vector<128x3xf32> to vector<128x1xf32>
    %34 = vector.extract_strided_slice %5 {offsets = [2, 0], sizes = [1, 128], strides = [1, 1]} : vector<3x128xf32> to vector<1x128xf32>
    %35 = vector.broadcast %33 : vector<128x1xf32> to vector<128x128xf32>
    %36 = vector.broadcast %34 : vector<1x128xf32> to vector<128x128xf32>
    %37 = arith.subf %35, %36 : vector<128x128xf32>
    %38 = arith.mulf %27, %27 : vector<128x128xf32>
    %39 = arith.mulf %32, %32 : vector<128x128xf32>
    %40 = arith.addf %38, %39 : vector<128x128xf32>
    %41 = arith.mulf %37, %37 : vector<128x128xf32>
    %42 = arith.addf %40, %41 : vector<128x128xf32>
    %cst = arith.constant 0.000000e+00 : f32
    %43 = vector.broadcast %cst : f32 to vector<1x128xf32>
    %cst_15 = arith.constant dense<0x7F800000> : vector<128xf32>
    %44 = vector.multi_reduction <minimumf>, %42, %cst_15 [0] : vector<128x128xf32> to vector<128xf32>
    %45 = vector.shape_cast %44 : vector<128xf32> to vector<1x128xf32>
    %46 = vector.broadcast %45 : vector<1x128xf32> to vector<128x128xf32>
    %47 = arith.cmpf oeq, %42, %46 : vector<128x128xf32>
    %cst_16 = arith.constant 1.000000e+00 : f32
    %cst_17 = arith.constant 0.000000e+00 : f32
    %48 = vector.broadcast %cst_16 : f32 to vector<128x128xf32>
    %49 = vector.broadcast %cst_17 : f32 to vector<128x128xf32>
    %50 = arith.select %47, %48, %49 : vector<128x128xi1>, vector<128x128xf32>
    %cst_18 = arith.constant dense<0.000000e+00> : vector<4x128xf32>
    %51 = tpu.matmul %7, %50, %cst_18 {dimension_numbers = #tpu.dot_dimension_numbers<[1], [0], [0], [1], [0, 0, 1, 1], [], []>} : vector<4x128xf32>, vector<128x128xf32>, vector<4x128xf32> -> vector<4x128xf32>
    %52 = vector.extract_strided_slice %51 {offsets = [0, 0], sizes = [1, 128], strides = [1, 1]} : vector<4x128xf32> to vector<1x128xf32>
    %cst_19 = arith.constant 1.000000e+00 : f32
    %53 = vector.broadcast %cst_19 : f32 to vector<1x128xf32>
    %54 = arith.divf %53, %52 : vector<1x128xf32>
    %55 = vector.extract_strided_slice %51 {offsets = [1, 0], sizes = [3, 128], strides = [1, 1]} : vector<4x128xf32> to vector<3x128xf32>
    %56 = vector.broadcast %54 : vector<1x128xf32> to vector<3x128xf32>
    %57 = arith.mulf %55, %56 : vector<3x128xf32>
    %58 = arith.subf %10, %57 : vector<3x128xf32>
    %59 = math.absf %58 : vector<3x128xf32>
    %60 = vector.extract_strided_slice %59 {offsets = [0, 0], sizes = [1, 128], strides = [1, 1]} : vector<3x128xf32> to vector<1x128xf32>
    %61 = vector.extract_strided_slice %59 {offsets = [1, 0], sizes = [1, 128], strides = [1, 1]} : vector<3x128xf32> to vector<1x128xf32>
    %62 = arith.addf %60, %61 : vector<1x128xf32>
    %63 = vector.extract_strided_slice %59 {offsets = [2, 0], sizes = [1, 128], strides = [1, 1]} : vector<3x128xf32> to vector<1x128xf32>
    %64 = arith.addf %62, %63 : vector<1x128xf32>
    %cst_20 = arith.constant 1.000000e+02 : f32
    %65 = vector.broadcast %cst_20 : f32 to vector<1x128xf32>
    %66 = arith.cmpf ole, %45, %65 : vector<1x128xf32>
    %cst_21 = arith.constant 0.000000e+00 : f32
    %67 = vector.broadcast %cst_21 : f32 to vector<1x128xf32>
    %68 = arith.select %66, %64, %67 : vector<1x128xi1>, vector<1x128xf32>
    %69 = arith.addf %43, %68 : vector<1x128xf32>
    %cst_22 = arith.constant 1.000000e+30 : f32
    %70 = vector.broadcast %cst_22 : f32 to vector<128x128xf32>
    %71 = arith.select %47, %70, %42 : vector<128x128xi1>, vector<128x128xf32>
    %cst_23 = arith.constant dense<0x7F800000> : vector<128xf32>
    %72 = vector.multi_reduction <minimumf>, %71, %cst_23 [0] : vector<128x128xf32> to vector<128xf32>
    %73 = vector.shape_cast %72 : vector<128xf32> to vector<1x128xf32>
    %74 = vector.broadcast %73 : vector<1x128xf32> to vector<128x128xf32>
    %75 = arith.cmpf oeq, %71, %74 : vector<128x128xf32>
    %cst_24 = arith.constant 1.000000e+00 : f32
    %cst_25 = arith.constant 0.000000e+00 : f32
    %76 = vector.broadcast %cst_24 : f32 to vector<128x128xf32>
    %77 = vector.broadcast %cst_25 : f32 to vector<128x128xf32>
    %78 = arith.select %75, %76, %77 : vector<128x128xi1>, vector<128x128xf32>
    %cst_26 = arith.constant dense<0.000000e+00> : vector<4x128xf32>
    %79 = tpu.matmul %7, %78, %cst_26 {dimension_numbers = #tpu.dot_dimension_numbers<[1], [0], [0], [1], [0, 0, 1, 1], [], []>} : vector<4x128xf32>, vector<128x128xf32>, vector<4x128xf32> -> vector<4x128xf32>
    %80 = vector.extract_strided_slice %79 {offsets = [0, 0], sizes = [1, 128], strides = [1, 1]} : vector<4x128xf32> to vector<1x128xf32>
    %cst_27 = arith.constant 1.000000e+00 : f32
    %81 = vector.broadcast %cst_27 : f32 to vector<1x128xf32>
    %82 = arith.divf %81, %80 : vector<1x128xf32>
    %83 = vector.extract_strided_slice %79 {offsets = [1, 0], sizes = [3, 128], strides = [1, 1]} : vector<4x128xf32> to vector<3x128xf32>
    %84 = vector.broadcast %82 : vector<1x128xf32> to vector<3x128xf32>
    %85 = arith.mulf %83, %84 : vector<3x128xf32>
    %86 = arith.subf %10, %85 : vector<3x128xf32>
    %87 = math.absf %86 : vector<3x128xf32>
    %88 = vector.extract_strided_slice %87 {offsets = [0, 0], sizes = [1, 128], strides = [1, 1]} : vector<3x128xf32> to vector<1x128xf32>
    %89 = vector.extract_strided_slice %87 {offsets = [1, 0], sizes = [1, 128], strides = [1, 1]} : vector<3x128xf32> to vector<1x128xf32>
    %90 = arith.addf %88, %89 : vector<1x128xf32>
    %91 = vector.extract_strided_slice %87 {offsets = [2, 0], sizes = [1, 128], strides = [1, 1]} : vector<3x128xf32> to vector<1x128xf32>
    %92 = arith.addf %90, %91 : vector<1x128xf32>
    %cst_28 = arith.constant 1.000000e+02 : f32
    %93 = vector.broadcast %cst_28 : f32 to vector<1x128xf32>
    %94 = arith.cmpf ole, %73, %93 : vector<1x128xf32>
    %cst_29 = arith.constant 0.000000e+00 : f32
    %95 = vector.broadcast %cst_29 : f32 to vector<1x128xf32>
    %96 = arith.select %94, %92, %95 : vector<1x128xi1>, vector<1x128xf32>
    %97 = arith.addf %69, %96 : vector<1x128xf32>
    %cst_30 = arith.constant 1.000000e+30 : f32
    %98 = vector.broadcast %cst_30 : f32 to vector<128x128xf32>
    %99 = arith.select %75, %98, %71 : vector<128x128xi1>, vector<128x128xf32>
    %cst_31 = arith.constant dense<0x7F800000> : vector<128xf32>
    %100 = vector.multi_reduction <minimumf>, %99, %cst_31 [0] : vector<128x128xf32> to vector<128xf32>
    %101 = vector.shape_cast %100 : vector<128xf32> to vector<1x128xf32>
    %102 = vector.broadcast %101 : vector<1x128xf32> to vector<128x128xf32>
    %103 = arith.cmpf oeq, %99, %102 : vector<128x128xf32>
    %cst_32 = arith.constant 1.000000e+00 : f32
    %cst_33 = arith.constant 0.000000e+00 : f32
    %104 = vector.broadcast %cst_32 : f32 to vector<128x128xf32>
    %105 = vector.broadcast %cst_33 : f32 to vector<128x128xf32>
    %106 = arith.select %103, %104, %105 : vector<128x128xi1>, vector<128x128xf32>
    %cst_34 = arith.constant dense<0.000000e+00> : vector<4x128xf32>
    %107 = tpu.matmul %7, %106, %cst_34 {dimension_numbers = #tpu.dot_dimension_numbers<[1], [0], [0], [1], [0, 0, 1, 1], [], []>} : vector<4x128xf32>, vector<128x128xf32>, vector<4x128xf32> -> vector<4x128xf32>
    %108 = vector.extract_strided_slice %107 {offsets = [0, 0], sizes = [1, 128], strides = [1, 1]} : vector<4x128xf32> to vector<1x128xf32>
    %cst_35 = arith.constant 1.000000e+00 : f32
    %109 = vector.broadcast %cst_35 : f32 to vector<1x128xf32>
    %110 = arith.divf %109, %108 : vector<1x128xf32>
    %111 = vector.extract_strided_slice %107 {offsets = [1, 0], sizes = [3, 128], strides = [1, 1]} : vector<4x128xf32> to vector<3x128xf32>
    %112 = vector.broadcast %110 : vector<1x128xf32> to vector<3x128xf32>
    %113 = arith.mulf %111, %112 : vector<3x128xf32>
    %114 = arith.subf %10, %113 : vector<3x128xf32>
    %115 = math.absf %114 : vector<3x128xf32>
    %116 = vector.extract_strided_slice %115 {offsets = [0, 0], sizes = [1, 128], strides = [1, 1]} : vector<3x128xf32> to vector<1x128xf32>
    %117 = vector.extract_strided_slice %115 {offsets = [1, 0], sizes = [1, 128], strides = [1, 1]} : vector<3x128xf32> to vector<1x128xf32>
    %118 = arith.addf %116, %117 : vector<1x128xf32>
    %119 = vector.extract_strided_slice %115 {offsets = [2, 0], sizes = [1, 128], strides = [1, 1]} : vector<3x128xf32> to vector<1x128xf32>
    %120 = arith.addf %118, %119 : vector<1x128xf32>
    %cst_36 = arith.constant 1.000000e+02 : f32
    %121 = vector.broadcast %cst_36 : f32 to vector<1x128xf32>
    %122 = arith.cmpf ole, %101, %121 : vector<1x128xf32>
    %cst_37 = arith.constant 0.000000e+00 : f32
    %123 = vector.broadcast %cst_37 : f32 to vector<1x128xf32>
    %124 = arith.select %122, %120, %123 : vector<1x128xi1>, vector<1x128xf32>
    %125 = arith.addf %97, %124 : vector<1x128xf32>
    %cst_38 = arith.constant 1.000000e+30 : f32
    %126 = vector.broadcast %cst_38 : f32 to vector<128x128xf32>
    %127 = arith.select %103, %126, %99 : vector<128x128xi1>, vector<128x128xf32>
    %cst_39 = arith.constant dense<0x7F800000> : vector<128xf32>
    %128 = vector.multi_reduction <minimumf>, %127, %cst_39 [0] : vector<128x128xf32> to vector<128xf32>
    %129 = vector.shape_cast %128 : vector<128xf32> to vector<1x128xf32>
    %130 = vector.broadcast %129 : vector<1x128xf32> to vector<128x128xf32>
    %131 = arith.cmpf oeq, %127, %130 : vector<128x128xf32>
    %cst_40 = arith.constant 1.000000e+00 : f32
    %cst_41 = arith.constant 0.000000e+00 : f32
    %132 = vector.broadcast %cst_40 : f32 to vector<128x128xf32>
    %133 = vector.broadcast %cst_41 : f32 to vector<128x128xf32>
    %134 = arith.select %131, %132, %133 : vector<128x128xi1>, vector<128x128xf32>
    %cst_42 = arith.constant dense<0.000000e+00> : vector<4x128xf32>
    %135 = tpu.matmul %7, %134, %cst_42 {dimension_numbers = #tpu.dot_dimension_numbers<[1], [0], [0], [1], [0, 0, 1, 1], [], []>} : vector<4x128xf32>, vector<128x128xf32>, vector<4x128xf32> -> vector<4x128xf32>
    %136 = vector.extract_strided_slice %135 {offsets = [0, 0], sizes = [1, 128], strides = [1, 1]} : vector<4x128xf32> to vector<1x128xf32>
    %cst_43 = arith.constant 1.000000e+00 : f32
    %137 = vector.broadcast %cst_43 : f32 to vector<1x128xf32>
    %138 = arith.divf %137, %136 : vector<1x128xf32>
    %139 = vector.extract_strided_slice %135 {offsets = [1, 0], sizes = [3, 128], strides = [1, 1]} : vector<4x128xf32> to vector<3x128xf32>
    %140 = vector.broadcast %138 : vector<1x128xf32> to vector<3x128xf32>
    %141 = arith.mulf %139, %140 : vector<3x128xf32>
    %142 = arith.subf %10, %141 : vector<3x128xf32>
    %143 = math.absf %142 : vector<3x128xf32>
    %144 = vector.extract_strided_slice %143 {offsets = [0, 0], sizes = [1, 128], strides = [1, 1]} : vector<3x128xf32> to vector<1x128xf32>
    %145 = vector.extract_strided_slice %143 {offsets = [1, 0], sizes = [1, 128], strides = [1, 1]} : vector<3x128xf32> to vector<1x128xf32>
    %146 = arith.addf %144, %145 : vector<1x128xf32>
    %147 = vector.extract_strided_slice %143 {offsets = [2, 0], sizes = [1, 128], strides = [1, 1]} : vector<3x128xf32> to vector<1x128xf32>
    %148 = arith.addf %146, %147 : vector<1x128xf32>
    %cst_44 = arith.constant 1.000000e+02 : f32
    %149 = vector.broadcast %cst_44 : f32 to vector<1x128xf32>
    %150 = arith.cmpf ole, %129, %149 : vector<1x128xf32>
    %cst_45 = arith.constant 0.000000e+00 : f32
    %151 = vector.broadcast %cst_45 : f32 to vector<1x128xf32>
    %152 = arith.select %150, %148, %151 : vector<1x128xi1>, vector<1x128xf32>
    %153 = arith.addf %125, %152 : vector<1x128xf32>
    %cst_46 = arith.constant 2.500000e-01 : f32
    %154 = vector.broadcast %cst_46 : f32 to vector<1x128xf32>
    %155 = arith.mulf %153, %154 : vector<1x128xf32>
    %c0_47 = arith.constant 0 : index
    %c0_48 = arith.constant 0 : index
    %c0_49 = arith.constant 0 : index
    %156 = vector.load %arg7[%c0_47, %c0_48, %c0_49] : memref<1x1x128xf32, #tpu.memory_space<vmem>>, vector<1x1x128xf32>
    %157 = vector.shape_cast %156 : vector<1x1x128xf32> to vector<1x128xf32>
    %158 = vector.shape_cast %155 : vector<1x128xf32> to vector<1x1x128xf32>
    tpu.vector_store %arg7[%c0_47, %c0_48, %c0_49], %158 {strides = array<i32>} : memref<1x1x128xf32, #tpu.memory_space<vmem>>, vector<1x1x128xf32>,
    return
  }
  func.func @transform_0(%arg0: i32, %arg1: i32) -> (i32, i32, i32) {
    %c0_i32 = arith.constant 0 : i32
    %c0_i32_0 = arith.constant 0 : i32
    %c0_i32_1 = arith.constant 0 : i32
    return %arg0, %c0_i32, %c0_i32_0 : i32, i32, i32
  }
  func.func @transform_1(%arg0: i32, %arg1: i32) -> (i32, i32, i32) {
    %c0_i32 = arith.constant 0 : i32
    %c0_i32_0 = arith.constant 0 : i32
    return %arg0, %c0_i32, %arg1 : i32, i32, i32
  }
  func.func @transform_2(%arg0: i32, %arg1: i32) -> (i32, i32, i32) {
    %c0_i32 = arith.constant 0 : i32
    %c0_i32_0 = arith.constant 0 : i32
    %c0_i32_1 = arith.constant 0 : i32
    return %arg0, %c0_i32, %c0_i32_0 : i32, i32, i32
  }
  func.func @transform_3(%arg0: i32, %arg1: i32) -> (i32, i32, i32) {
    %c0_i32 = arith.constant 0 : i32
    %c0_i32_0 = arith.constant 0 : i32
    return %arg0, %c0_i32, %arg1 : i32, i32, i32
  }
  func.func @transform_4(%arg0: i32, %arg1: i32) -> (i32, i32, i32) {
    %c0_i32 = arith.constant 0 : i32
    %c0_i32_0 = arith.constant 0 : i32
    return %arg0, %c0_i32, %arg1 : i32, i32, i32
  }
  func.func @transform_5(%arg0: i32, %arg1: i32) -> (i32, i32, i32) {
    %c0_i32 = arith.constant 0 : i32
    %c0_i32_0 = arith.constant 0 : i32
    return %arg0, %c0_i32, %arg1 : i32, i32, i32
  }
}

</mosaic_0001>

<bundles_post_ra>
// kernel: tpu_custom_call.1
= control target key start
LH: loop header
LB: loop body
LE: loop exit
PB: predicated region body
PF: predicated region fallthrough
CT: control target
= control target key end

     0   :  { %11 = vsyncpa [#allocation3], 0  ;;  %s2625_s0 = inlined_call_operand.vmem [shape: f32[2,128,3], index: 0, kind: input, shape index: {}]   ;;  %s2626_s1 = inlined_call_operand.vmem [shape: f32[2,3,128], index: 1, kind: input, shape index: {}]   ;;  %s2627_s2 = inlined_call_operand.vmem [shape: f32[2,4,128], index: 2, kind: input, shape index: {}]   ;;  %s2628_s3 = inlined_call_operand.vmem [shape: f32[2,3,128], index: 3, kind: input, shape index: {}]   ;;  %s2629_s4 = inlined_call_operand.hbm [shape: f32[2,1,128], index: 4, kind: output, shape index: {0}]   ;;  %s2630_s5 = inlined_call_operand.hbm [shape: f32[2,1,128], index: 5, kind: output, shape index: {1}]  }
   0x1   :  { %13 = vsyncpa [#allocation3 + $0x1], 0 }
   0x2   :  { %14 = vsyncpa [#allocation5], 0 }
   0x3   :  { %16 = vsyncpa [#allocation5 + $0x1], 0  ;;  %s1646_s18 = smov 0   ;;  %s1648_s19 = smov 0  }
   0x4   :  { %s1650_s20 = smov 0   ;;  %s1652_s21 = smov 0  }
   0x5   :  { %s1654_s22 = smov 0   ;;  %s1656_s23 = smov 0  }
   0x6 LB: > { %s1332_s24 = sadd.s32 4294967295, %s1610_s23   ;;  %s1333_s25 = sadd.s32 4294967294, %s1610_s23   ;;  %s1610_s23 = sphi %s1656_s23, %s22_s23   ;;  %s1606_s22 = sphi %s1654_s22, %s2637_s22   ;;  %s1602_s21 = sphi %s1652_s21, %s2636_s21   ;;  %s1598_s20 = sphi %s1650_s20, %s2635_s20   ;;  %s1594_s19 = sphi %s1648_s19, %s2634_s19   ;;  %s1590_s18 = sphi %s1646_s18, %s2633_s18  }
   0x7   : > { %s34_s26 = sadd.s32 1, %s1606_s22  ;;  %s151_s27 = sadd.s32 1, %s1598_s20 }
   0x8   : > { %p36_p0 = scmp.ge.s32.totalorder %s34_s26, 2  ;;  %p161_p1 = scmp.ne.s32.totalorder %s1598_s20, %s1594_s19 }
   0x9   : > { %p162_p2 = scmp.eq.s32.totalorder %s1332_s24, 1  ;;  %p167_p3 = scmp.ne.s32.totalorder %s1594_s19, %s1590_s18 }
   0xa   : > { %s2639_s26 = smov (%p36_p0, %s34_s26), 0  ;;  %p168_p5 = scmp.eq.s32.totalorder %s1333_s25, 1 }
   0xb   : > { %p1686_p4 = por %p162_p2, %p161_p1  ;;  %s146_s29 = ssub.s32 %s1606_s22, %s2639_s26 }
   0xc   : > { %p1336_p6 = scmp.ge.s32.totalorder %s1610_s23, 1  ;;  %p149_p7 = scmp.eq.s32.totalorder %s146_s29, 0 }
   0xd   : > { %p1693_p8 = por %p168_p5, %p167_p3  ;;  %p249_p9 = scmp.lt.s32.totalorder %s1610_s23, 3 }
   0xe   : > { %s1699_s6 = scalar_select %p149_p7, %s1598_s20, %s151_s27  }
   0xf   : > { %p250_p10 = pnand %p1336_p6, %p249_p9 }
  0x10   : > { %p298_p11 = scmp.lt.s32.totalorder (!%p250_p10), %s1602_s21, 1  ;;  %s1178_s10 = scalar_lea.hbm (!%p250_p10), %s2629_s4, %s1602_s21 }
  0x11   : > { %253 = sbr.rel (%p250_p10) target bundleno = 606 (0x25e), region = 36  ;;  %s1182_s13 = sshll.u32 (!%p250_p10), %s1178_s10, 4  ;;  %s1183_s13 = int_to_ptr.hbm [resolvable:$true] %s1182_s13 }
  0x12   : > { %s1520_s25 = scalar_lea.hbm (!%p250_p10), %s2629_s4, 2 }
  0x16   : > { %v1612_v0 = vmov 0   ;;  %s1706_s7 = scalar_select %p298_p11, %s1602_s21, 1  ;;  %v1613_v9 = vmov 1   ;;  %v1614_v16 = vmov 2  }
  0x17   : > { %1475 = vset.pattern.permute.xlu2 %v1612_v0  ;;  %1474 = vset.pattern.permute.xlu1 %v1612_v0 }
  0x18   : > { %1473 = vset.pattern.permute.xlu0 %v1612_v0  ;;  %s1408_s8 = sshll.u32 %s1706_s7, 7  ;;  %s1761_s12 = sshll.u32 %s1706_s7, 2 }
  0x19   : > { %s1712_s11 = scalar_lea.vmem %s2625_s0, %s1408_s8  ;;  %s309_s15 = scalar_lea.vmem %s2626_s1, %s1761_s12 }
  0x1a   : > { %v326_v1 = vld [vmem:[%s1712_s11 + $0x20] sm:$0xff]  ;;  %v324_v2 = vld [vmem:[%s1712_s11 + $0x10] sm:$0xff]  ;;  %v327_v4 = vld [vmem:[%s1712_s11 + $0x28] sm:$0xff]  ;;  %s2093_s24 = scalar_lea.vmem %s2627_s2, %s1761_s12  ;;  %s320_s29 = scalar_lea.vmem %s2628_s3, %s1761_s12 }
  0x1b   : > { %377 = vperm.xlu2 %1475, %v326_v1   ;;  %367 = vperm.xlu1 %1474, %v324_v2   ;;  %v322_v3 = vld [vmem:[%s1712_s11] sm:$0xff]  ;;  %v325_v5 = vld [vmem:[%s1712_s11 + $0x18] sm:$0xff]  ;;  %v323_v6 = vld [vmem:[%s1712_s11 + $0x8] sm:$0xff]  ;;  %s2565_s7 = sand.u32 1, %s1594_s19  }
  0x1c   : > { %357 = vperm.xlu0 %1473, %v322_v3   ;;  %v329_v7 = vld [vmem:[%s1712_s11 + $0x38] sm:$0xff]  ;;  %v328_v8 = vld [vmem:[%s1712_s11 + $0x30] sm:$0xff]  ;;  %v1724_v10 = vld [vmem:[%s1712_s11 + $0x48] sm:$0xff]  ;;  %s1165_s14 = scalar_lea.sflag [#allocation3], %s2565_s7 }
  0x1d   : > { %v1729_v11 = vld [vmem:[%s1712_s11 + $0x60] sm:$0xff]  ;;  %v332_v13 = vld [vmem:[%s1712_s11 + $0x50] sm:$0xff]  ;;  %v1740_v14 = vld [vmem:[%s1712_s11 + $0x58] sm:$0xff] }
  0x1e   : > { %v1733_v12 = vld [vmem:[%s1712_s11 + $0x40] sm:$0xff]  ;;  %v1749_v15 = vld [vmem:[%s1712_s11 + $0x68] sm:$0xff]  ;;  %v337_v18 = vld [vmem:[%s1712_s11 + $0x78] sm:$0xff] }
  0x1f   : > { %v336_v20 = vld [vmem:[%s1712_s11 + $0x70] sm:$0xff]  ;;  %v338_v22 = vld [vmem:[%s309_s15] sm:$0x7]  ;;  %s291_s11 = scalar_lea.vmem [#allocation2], %s2565_s7  ;;  %s1514_s15 = sshra.s32 %s1183_s13, 4  ;;  %s1515_s15 = int_to_ptr.hbm [resolvable:$true] %s1514_s15 }
  0x20   : > { %v1767_v23 = vperm.slane %v338_v22, 1  ;;  %v1772_v25 = vperm.slane %v338_v22, 0  ;;  %s1180_s12 = sshll.u32 %s291_s11, 4  ;;  %s1516_s16 = scalar_lea.hbm %s1515_s15, 1  ;;  %s1181_s12 = int_to_ptr.vmem [resolvable:$true] %s1180_s12 }
  0x21   : > { %p1517_p12 = scmp.ne.s32.totalorder %s1515_s15, %s1516_s16  ;;  %p1521_p1 = scmp.lt.s32.totalorder %s1515_s15, %s2629_s4 }
  0x22   : > { %p1522_p2 = scmp.lt.s32.totalorder %s1520_s25, %s1516_s16 }
  0x23   : > { %382 = vperm.xlu2 %1475, %v327_v4   ;;  %372 = vperm.xlu1 %1474, %v325_v5   ;;  %p1518_p13 = pnand %p1517_p12, %p1686_p4 }
  0x24   : > { %362 = vperm.xlu0 %1473, %v323_v6   ;;  %p1523_p3 = por %p1522_p2, %p1521_p1 }
  0x25   : > { %p1519_p0 = pneg %p1518_p13 }
  0x27   : > { %p1524_p5 = pnand %p1523_p3, %p1519_p0 }
  0x2b   : > { %1476 = vset.pattern.permute.xlu2 %v1613_v9  ;;  %392 = vperm.xlu1 %1474, %v329_v7  }
  0x2c   : > { %387 = vperm.xlu0 %1473, %v328_v8   ;;  %453 = vperm.xlu2 %1476, %v322_v3  }
  0x33   : > { %1477 = vset.pattern.permute.xlu1 %v1613_v9 }
  0x34   : > { %402 = vperm.xlu0 %1473, %v1724_v10   ;;  %461 = vperm.xlu1 %1477, %v324_v2  }
  0x35   : > { %465 = vperm.xlu2 %1476, %v325_v5  }
  0x3c   : > { %417 = vperm.xlu0 %1473, %v1729_v11   ;;  %469 = vperm.xlu1 %1477, %v326_v1  }
  0x3d   : > { %473 = vperm.xlu2 %1476, %v327_v4  }
  0x44   : > { %1484 = vset.pattern.permute.xlu0 %v1613_v9  ;;  %481 = vperm.xlu1 %1477, %v329_v7  }
  0x45   : > { %1478 = vset.pattern.permute.xlu2 %v1612_v0  ;;  %457 = vperm.xlu0 %1484, %v323_v6  }
  0x46   : > { %397 = vperm.xlu2 %1478, %v1733_v12  }
  0x4c   : > { %1479 = vset.pattern.permute.xlu1 %v1612_v0 }
  0x4d   : > { %477 = vperm.xlu0 %1484, %v328_v8   ;;  %407 = vperm.xlu1 %1479, %v332_v13  }
  0x4e   : > { %412 = vperm.xlu2 %1478, %v1740_v14  }
  0x55   : > { %493 = vperm.xlu0 %1484, %v332_v13   ;;  %1480 = vset.pattern.permute.xlu1 %v1613_v9 }
  0x56   : > { %1481 = vset.pattern.permute.xlu2 %v1613_v9  ;;  %485 = vperm.xlu1 %1480, %v1733_v12  }
  0x57   : > { %489 = vperm.xlu2 %1481, %v1724_v10  }
  0x5d   : > { %505 = vperm.xlu0 %1484, %v1749_v15  }
  0x5e   : > { %497 = vperm.xlu1 %1480, %v1740_v14  }
  0x5f   : > { %1482 = vset.pattern.permute.xlu2 %v1614_v16 }
  0x60   : > { %534 = vperm.xlu2 %1482, %v322_v3   ;;  %v1809_v3 = vperm.slane %v338_v22, 2 }
  0x65   : > { %1488 = vset.pattern.permute.xlu0 %v1614_v16 }
  0x66   : > { %546 = vperm.xlu0 %1488, %v325_v5   ;;  %1483 = vset.pattern.permute.xlu1 %v1614_v16 }
  0x67   : > { %538 = vperm.xlu1 %1483, %v323_v6  }
  0x68   : > { %542 = vperm.xlu2 %1482, %v324_v2  }
  0x6e   : > { %574 = vperm.xlu0 %1488, %v332_v13  }
  0x6f   : > { %550 = vperm.xlu1 %1483, %v326_v1  }
  0x70   : > { %554 = vperm.xlu2 %1482, %v327_v4  }
  0x75   : > { %v1753_v17 = vpop.permute.xlu2 %377 }
  0x76   : > { %594 = vperm.xlu0 %1488, %v337_v18   ;;  %v440_v57 = vsub.f32 %v1753_v17, %v1772_v25 }
  0x77   : > { %558 = vperm.xlu1 %1483, %v328_v8  }
  0x78   : > { %562 = vperm.xlu2 %1482, %v329_v7   ;;  %v618_v61 = vmul.f32 %v440_v57, %v440_v57 }
  0x7d   : > { %v383_v19 = vpop.permute.xlu2 %382 }
  0x7e   : > { %v441_v35 = vsub.f32 %v383_v19, %v1772_v25 }
  0x7f   : > { %1485 = vset.pattern.permute.xlu1 %v1612_v0 }
  0x80   : > { %1486 = vset.pattern.permute.xlu2 %v1612_v0  ;;  %422 = vperm.xlu1 %1485, %v1749_v15   ;;  %v619_v42 = vmul.f32 %v441_v35, %v441_v35 }
  0x81   : > { %427 = vperm.xlu2 %1486, %v336_v20  }
  0x86   : > { %v454_v21 = vpop.permute.xlu2 %453 }
  0x87   : > { %v517_v24 = vsub.f32 %v454_v21, %v1767_v23 }
  0x88   : > { %432 = vperm.xlu1 %1485, %v337_v18  }
  0x89   : > { %1487 = vset.pattern.permute.xlu2 %v1613_v9  ;;  %v630_v28 = vmul.f32 %v517_v24, %v517_v24 }
  0x8a   : > { %501 = vperm.xlu2 %1487, %v1729_v11  }
  0x8d   : > { %v368_v26 = vpop.permute.xlu1 %367 }
  0x8e   : > { %v358_v27 = vpop.permute.xlu0 %357  ;;  %v438_v49 = vsub.f32 %v368_v26, %v1772_v25 }
  0x8f   : > { %v466_v29 = vpop.permute.xlu2 %465  ;;  %v436_v30 = vsub.f32 %v358_v27, %v1772_v25 }
  0x90   : > { %1489 = vset.pattern.permute.xlu1 %v1613_v9  ;;  %v520_v32 = vsub.f32 %v466_v29, %v1767_v23  ;;  %v616_v54 = vmul.f32 %v438_v49, %v438_v49 }
  0x91   : > { %v614_v31 = vmul.f32 %v436_v30, %v436_v30  ;;  %509 = vperm.xlu1 %1489, %v336_v20  }
  0x92   : > { %513 = vperm.xlu2 %1487, %v337_v18   ;;  %v633_v36 = vmul.f32 %v520_v32, %v520_v32 }
  0x93   : > { %v646_v33 = vadd.f32 %v630_v28, %v614_v31 }
  0x95   : > { %v373_v34 = vpop.permute.xlu1 %372 }
  0x96   : > { %v439_v37 = vsub.f32 %v373_v34, %v1772_v25  ;;  %v1779_v38 = vpop.permute.xlu0 %362 }
  0x97   : > { %v474_v39 = vpop.permute.xlu2 %473 }
  0x98   : > { %v617_v40 = vmul.f32 %v439_v37, %v439_v37  ;;  %v522_v41 = vsub.f32 %v474_v39, %v1767_v23 }
  0x99   : > { %1490 = vset.pattern.permute.xlu1 %v1614_v16 }
  0x9a   : > { %v1782_v43 = vadd.f32 %v633_v36, %v617_v40  ;;  %v635_v44 = vmul.f32 %v522_v41, %v522_v41  ;;  %1491 = vset.pattern.permute.xlu2 %v1614_v16  ;;  %566 = vperm.xlu1 %1490, %v1733_v12  }
  0x9b   : > { %570 = vperm.xlu2 %1491, %v1724_v10  }
  0x9c   : > { %v1786_v45 = vadd.f32 %v635_v44, %v619_v42 }
  0x9d   : > { %v393_v46 = vpop.permute.xlu1 %392 }
  0x9e   : > { %v1788_v47 = vpop.permute.xlu0 %387  ;;  %v443_v1 = vsub.f32 %v393_v46, %v1772_v25 }
  0xa0   : > { %v398_v48 = vpop.permute.xlu2 %397  ;;  %v621_v6 = vmul.f32 %v443_v1, %v443_v1 }
  0xa1   : > { %v444_v16 = vsub.f32 %v398_v48, %v1772_v25 }
  0xa2   : > { %578 = vperm.xlu1 %1490, %v1740_v14  }
  0xa3   : > { %582 = vperm.xlu2 %1491, %v1729_v11   ;;  %v622_v21 = vmul.f32 %v444_v16, %v444_v16 }
  0xa6   : > { %v462_v50 = vpop.permute.xlu1 %461  ;;  %v1793_v51 = vpop.permute.xlu0 %402 }
  0xa7   : > { %v519_v52 = vsub.f32 %v462_v50, %v1767_v23 }
  0xa8   : > { %v413_v53 = vpop.permute.xlu2 %412 }
  0xa9   : > { %v632_v55 = vmul.f32 %v519_v52, %v519_v52  ;;  %v447_v26 = vsub.f32 %v413_v53, %v1772_v25 }
  0xaa   : > { %586 = vperm.xlu1 %1490, %v1749_v15  }
  0xab   : > { %v1797_v56 = vadd.f32 %v632_v55, %v616_v54  ;;  %590 = vperm.xlu2 %1491, %v336_v20   ;;  %v625_v31 = vmul.f32 %v447_v26, %v447_v26 }
  0xae   : > { %v470_v58 = vpop.permute.xlu1 %469  ;;  %v1801_v59 = vpop.permute.xlu0 %417 }
  0xaf   : > { %v521_v60 = vsub.f32 %v470_v58, %v1767_v23 }
  0xb1   : > { %v634_v62 = vmul.f32 %v521_v60, %v521_v60  ;;  %v1804_v63 = vpop.permute.xlu2 %489 }
  0xb3   : > { %v1806_v0 = vadd.f32 %v634_v62, %v618_v61 }
  0xb6   : > { %v482_v2 = vpop.permute.xlu1 %481 }
  0xb7   : > { %v524_v4 = vsub.f32 %v482_v2, %v1767_v23  ;;  %v458_v5 = vpop.permute.xlu0 %457  ;;  %v442_v2 = vsub.f32 %v1788_v47, %v1772_v25 }
  0xb8   : > { %v518_v34 = vsub.f32 %v458_v5, %v1767_v23 }
  0xb9   : > { %v637_v7 = vmul.f32 %v524_v4, %v524_v4 }
  0xba   : > { %v535_v8 = vpop.permute.xlu2 %534  ;;  %v631_v40 = vmul.f32 %v518_v34, %v518_v34 }
  0xbb   : > { %v653_v9 = vadd.f32 %v637_v7, %v621_v6  ;;  %v598_v10 = vsub.f32 %v535_v8, %v1809_v3 }
  0xbd   : > { %v662_v11 = vmul.f32 %v598_v10, %v598_v10 }
  0xbf   : > { %v1813_v12 = vadd.f32 %v662_v11, %v646_v33  ;;  %v478_v13 = vpop.permute.xlu0 %477  ;;  %v408_v14 = vpop.permute.xlu1 %407  ;;  %v437_v33 = vsub.f32 %v1779_v38, %v1772_v25 }
  0xc0   : > { %v446_v11 = vsub.f32 %v408_v14, %v1772_v25 }
  0xc1   : > { %v615_v39 = vmul.f32 %v437_v33, %v437_v33 }
  0xc2   : > { %v543_v15 = vpop.permute.xlu2 %542 }
  0xc3   : > { %v647_v52 = vadd.f32 %v631_v40, %v615_v39  ;;  %v600_v6 = vsub.f32 %v543_v15, %v1809_v3 }
  0xc7   : > { %v494_v17 = vpop.permute.xlu0 %493 }
  0xc8   : > { %v486_v18 = vpop.permute.xlu1 %485  ;;  %v527_v7 = vsub.f32 %v494_v17, %v1767_v23 }
  0xc9   : > { %v525_v19 = vsub.f32 %v486_v18, %v1767_v23  ;;  %v664_v18 = vmul.f32 %v600_v6, %v600_v6 }
  0xca   : > { %v555_v20 = vpop.permute.xlu2 %554 }
  0xcb   : > { %v638_v22 = vmul.f32 %v525_v19, %v525_v19  ;;  %v603_v37 = vsub.f32 %v555_v20, %v1809_v3  ;;  %v640_v19 = vmul.f32 %v527_v7, %v527_v7  ;;  %v1861_v26 = vadd.f32 %v664_v18, %v1797_v56 }
  0xcd   : > { %v1817_v24 = vadd.f32 %v638_v22, %v622_v21  ;;  %v667_v48 = vmul.f32 %v603_v37, %v603_v37  ;;  %v624_v21 = vmul.f32 %v446_v11, %v446_v11 }
  0xcf   : > { %v1820_v27 = vpop.permute.xlu0 %505  ;;  %v1838_v57 = vadd.f32 %v667_v48, %v1786_v45 }
  0xd0   : > { %v498_v28 = vpop.permute.xlu1 %497 }
  0xd1   : > { %v528_v29 = vsub.f32 %v498_v28, %v1767_v23  ;;  %v656_v28 = vadd.f32 %v640_v19, %v624_v21 }
  0xd2   : > { %v563_v30 = vpop.permute.xlu2 %562 }
  0xd3   : > { %v641_v32 = vmul.f32 %v528_v29, %v528_v29  ;;  %v605_v36 = vsub.f32 %v563_v30, %v1809_v3  ;;  %v445_v29 = vsub.f32 %v1793_v51, %v1772_v25  ;;  %v526_v30 = vsub.f32 %v1804_v63, %v1767_v23 }
  0xd5   : > { %v1826_v35 = vadd.f32 %v641_v32, %v625_v31  ;;  %v669_v42 = vmul.f32 %v605_v36, %v605_v36  ;;  %v623_v36 = vmul.f32 %v445_v29, %v445_v29  ;;  %v639_v56 = vmul.f32 %v526_v30, %v526_v30 }
  0xd7   : > { %v1832_v54 = vadd.f32 %v669_v42, %v653_v9  ;;  %v620_v9 = vmul.f32 %v442_v2, %v442_v2  ;;  %v655_v40 = vadd.f32 %v639_v56, %v623_v36 }
  0xd8   : > { %v547_v41 = vpop.permute.xlu0 %546 }
  0xd9   : > { %v601_v44 = vsub.f32 %v547_v41, %v1809_v3  ;;  %v539_v46 = vpop.permute.xlu1 %538 }
  0xda   : > { %v599_v49 = vsub.f32 %v539_v46, %v1809_v3 }
  0xdb   : > { %v665_v50 = vmul.f32 %v601_v44, %v601_v44  ;;  %v428_v38 = vpop.permute.xlu2 %427 }
  0xdc   : > { %v663_v53 = vmul.f32 %v599_v49, %v599_v49 }
  0xdd   : > { %v1835_v55 = vadd.f32 %v665_v50, %v1782_v43  ;;  %v523_v43 = vsub.f32 %v478_v13, %v1767_v23 }
  0xde   : > { %v1840_v58 = vadd.f32 %v663_v53, %v647_v52  ;;  %v450_v52 = vsub.f32 %v428_v38, %v1772_v25 }
  0xdf   : > { %v697_v60 = vmin.f32 %v1835_v55, %v1832_v54  ;;  %v636_v10 = vmul.f32 %v523_v43, %v523_v43 }
  0xe0   : > { %v695_v61 = vmin.f32 %v1840_v58, %v1838_v57  ;;  %v575_v45 = vpop.permute.xlu0 %574  ;;  %v628_v6 = vmul.f32 %v450_v52, %v450_v52 }
  0xe1   : > { %v551_v62 = vpop.permute.xlu1 %550  ;;  %v608_v16 = vsub.f32 %v575_v45, %v1809_v3  ;;  %v652_v15 = vadd.f32 %v636_v10, %v620_v9 }
  0xe2   : > { %v602_v1 = vsub.f32 %v551_v62, %v1809_v3 }
  0xe3   : > { %v672_v17 = vmul.f32 %v608_v16, %v608_v16 }
  0xe4   : > { %v666_v4 = vmul.f32 %v602_v1, %v602_v1  ;;  %v502_v5 = vpop.permute.xlu2 %501 }
  0xe5   : > { %v1869_v31 = vadd.f32 %v672_v17, %v656_v28  ;;  %v529_v19 = vsub.f32 %v502_v5, %v1767_v23  ;;  %v448_v17 = vsub.f32 %v1801_v59, %v1772_v25 }
  0xe6   : > { %v1853_v8 = vadd.f32 %v666_v4, %v1806_v0 }
  0xe7   : > { %v642_v29 = vmul.f32 %v529_v19, %v529_v19 }
  0xe8   : > { %v694_v47 = vmin.f32 %v1813_v12, %v1853_v8  ;;  %v595_v43 = vpop.permute.xlu0 %594 }
  0xe9   : > { %v559_v13 = vpop.permute.xlu1 %558  ;;  %v613_v10 = vsub.f32 %v595_v43, %v1809_v3 }
  0xea   : > { %v604_v20 = vsub.f32 %v559_v13, %v1809_v3 }
  0xeb   : > { %v677_v21 = vmul.f32 %v613_v10, %v613_v10 }
  0xec   : > { %v668_v22 = vmul.f32 %v604_v20, %v604_v20  ;;  %v514_v0 = vpop.permute.xlu2 %513 }
  0xed   : > { %v532_v62 = vsub.f32 %v514_v0, %v1767_v23 }
  0xee   : > { %v1863_v14 = vadd.f32 %v668_v22, %v652_v15  ;;  %v530_v22 = vsub.f32 %v1820_v27, %v1767_v23 }
  0xef   : > { %v645_v7 = vmul.f32 %v532_v62, %v532_v62 }
  0xf0   : > { %v696_v32 = vmin.f32 %v1861_v26, %v1863_v14  ;;  %v643_v59 = vmul.f32 %v530_v22, %v530_v22 }
  0xf2   : > { %v423_v33 = vpop.permute.xlu1 %422  ;;  %v700_v34 = vmin.f32 %v696_v32, %v1869_v31 }
  0xf3   : > { %v449_v20 = vsub.f32 %v423_v33, %v1772_v25 }
  0xf5   : > { %v571_v37 = vpop.permute.xlu2 %570  ;;  %v627_v5 = vmul.f32 %v449_v20, %v449_v20 }
  0xf6   : > { %v607_v39 = vsub.f32 %v571_v37, %v1809_v3 }
  0xf7   : > { %v659_v37 = vadd.f32 %v643_v59, %v627_v5 }
  0xf8   : > { %v671_v41 = vmul.f32 %v607_v39, %v607_v39 }
  0xfa   : > { %v1875_v42 = vadd.f32 %v671_v41, %v655_v40  ;;  %v433_v51 = vpop.permute.xlu1 %432 }
  0xfb   : > { %v451_v1 = vsub.f32 %v433_v51, %v1772_v25  ;;  %v626_v25 = vmul.f32 %v448_v17, %v448_v17 }
  0xfc   : > { %v699_v63 = vmin.f32 %v695_v61, %v1875_v42 }
  0xfd   : > { %v583_v46 = vpop.permute.xlu2 %582  ;;  %v629_v9 = vmul.f32 %v451_v1, %v451_v1  ;;  %v658_v56 = vadd.f32 %v642_v29, %v626_v25 }
  0xff   : > { %v661_v15 = vadd.f32 %v645_v7, %v629_v9 }
 0x101   : > { %v1902_v30 = vadd.f32 %v677_v21, %v661_v15 }
 0x103   : > { %v510_v44 = vpop.permute.xlu1 %509 }
 0x104   : > { %v531_v49 = vsub.f32 %v510_v44, %v1767_v23 }
 0x105   : > { %v591_v53 = vpop.permute.xlu2 %590 }
 0x106   : > { %v644_v4 = vmul.f32 %v531_v49, %v531_v49  ;;  %v612_v45 = vsub.f32 %v591_v53, %v1809_v3 }
 0x108   : > { %v660_v16 = vadd.f32 %v644_v4, %v628_v6  ;;  %v676_v13 = vmul.f32 %v612_v45, %v612_v45 }
 0x10a   : > { %v1897_v0 = vadd.f32 %v676_v13, %v660_v16 }
 0x10c   : > { %v567_v48 = vpop.permute.xlu1 %566  ;;  %v704_v27 = vmin.f32 %v700_v34, %v1897_v0 }
 0x10d   : > { %v606_v50 = vsub.f32 %v567_v48, %v1809_v3 }
 0x10f   : > { %v670_v2 = vmul.f32 %v606_v50, %v606_v50 }
 0x111   : > { %v1885_v61 = vadd.f32 %v670_v2, %v1817_v24 }
 0x113   : > { %v698_v38 = vmin.f32 %v694_v47, %v1885_v61  ;;  %v610_v47 = vsub.f32 %v583_v46, %v1809_v3 }
 0x114   : > { %v579_v11 = vpop.permute.xlu1 %578 }
 0x115   : > { %v609_v18 = vsub.f32 %v579_v11, %v1809_v3  ;;  %v674_v23 = vmul.f32 %v610_v47, %v610_v47 }
 0x117   : > { %v673_v24 = vmul.f32 %v609_v18, %v609_v18  ;;  %v690_v41 = vadd.f32 %v674_v23, %v658_v56 }
 0x119   : > { %v1900_v28 = vadd.f32 %v673_v24, %v1826_v35  ;;  %v702_v44 = vmin.f32 %v698_v38, %v690_v41 }
 0x11b   : > { %v701_v32 = vmin.f32 %v697_v60, %v1900_v28 }
 0x11c   : > { %v587_v33 = vpop.permute.xlu1 %586 }
 0x11d   : > { %v705_v36 = vmin.f32 %v701_v32, %v1902_v30  ;;  %v611_v35 = vsub.f32 %v587_v33, %v1809_v3  ;;  %v1615_v3 = vmov 1.0  }
 0x11f   : > { %v707_v39 = vmin.f32 %v704_v27, %v705_v36  ;;  %v675_v40 = vmul.f32 %v611_v35, %v611_v35 }
 0x121   : > { %v691_v51 = vadd.f32 %v675_v40, %v659_v37 }
 0x123   : > { %v703_v46 = vmin.f32 %v699_v63, %v691_v51 }
 0x125   : > { %v706_v48 = vmin.f32 %v702_v44, %v703_v46 }
 0x127   : > { %v708_v60 = vmin.f32 %v706_v48, %v707_v39 }
 0x129   : > { %v709_v49 = vrot.slane %v708_v60, 4 }
 0x12b   : > { %v710_v50 = vmin.f32 %v708_v60, %v709_v49 }
 0x12d   : > { %v711_v52 = vrot.slane %v710_v50, 2 }
 0x12f   : > { %v712_v53 = vmin.f32 %v710_v50, %v711_v52 }
 0x131   : > { %v713_v62 = vrot.slane %v712_v53, 1 }
 0x133   : > { %v1911_v34 = vmin.f32 %v712_v53, %v713_v62 }
 0x135   : > { %vm730_vm0 = vcmp.eq.f32.partialorder %v1902_v30, %v1911_v34  ;;  %vm729_vm1 = vcmp.eq.f32.partialorder %v1897_v0, %v1911_v34  ;;  %vm728_vm2 = vcmp.eq.f32.partialorder %v691_v51, %v1911_v34  ;;  %vm726_vm3 = vcmp.eq.f32.partialorder %v1900_v28, %v1911_v34 }
 0x136   : > { %1342 = vmatpush.msk.msra.mxu0 %vm730_vm0, %v1615_v3  ;;  %vm727_vm4 = vcmp.eq.f32.partialorder %v690_v41, %v1911_v34  ;;  %v1929_v63 = vsel %vm726_vm3, 1e+30, %v1900_v28  ;;  %vm725_vm5 = vcmp.eq.f32.partialorder %v1869_v31, %v1911_v34  ;;  %vm724_vm6 = vcmp.eq.f32.partialorder %v1875_v42, %v1911_v34 }
 0x137   : > { %v1943_v1 = vsel %vm725_vm5, 1e+30, %v1869_v31  ;;  %v1949_v2 = vsel %vm724_vm6, 1e+30, %v1875_v42  ;;  %vm723_vm7 = vcmp.eq.f32.partialorder %v1885_v61, %v1911_v34  ;;  %vm722_vm8 = vcmp.eq.f32.partialorder %v1832_v54, %v1911_v34 }
 0x138   : > { %1343 = vmatpush.msk.msra.mxu0 %vm729_vm1, %v1615_v3  ;;  %v1959_v43 = vsel %vm723_vm7, 1e+30, %v1885_v61  ;;  %v1965_v4 = vsel %vm722_vm8, 1e+30, %v1832_v54  ;;  %vm717_vm9 = vcmp.eq.f32.partialorder %v1861_v26, %v1911_v34  ;;  %vm721_vm10 = vcmp.eq.f32.partialorder %v1863_v14, %v1911_v34 }
 0x139   : > { %v1978_v45 = vsel %vm717_vm9, 1e+30, %v1861_v26  ;;  %v1984_v6 = vsel %vm721_vm10, 1e+30, %v1863_v14  ;;  %vm716_vm11 = vcmp.eq.f32.partialorder %v1840_v58, %v1911_v34  ;;  %vm720_vm12 = vcmp.eq.f32.partialorder %v1838_v57, %v1911_v34 }
 0x13a   : > { %1344 = vmatpush.msk.msra.mxu0 %vm728_vm2, %v1615_v3  ;;  %v817_v7 = vmin.f32 %v1978_v45, %v1984_v6  ;;  %v1996_v9 = vsel %vm716_vm11, 1e+30, %v1840_v58  ;;  %v2002_v10 = vsel %vm720_vm12, 1e+30, %v1838_v57  ;;  %vm715_vm13 = vcmp.eq.f32.partialorder %v1813_v12, %v1911_v34 }
 0x13b   : > { %v816_v38 = vmin.f32 %v1996_v9, %v2002_v10  ;;  %vm719_vm14 = vcmp.eq.f32.partialorder %v1853_v8, %v1911_v34  ;;  %v2017_v11 = vsel %vm715_vm13, 1e+30, %v1813_v12  ;;  %vm718_vm15 = vcmp.eq.f32.partialorder %v1835_v55, %v1911_v34 }
 0x13c   : > { %1345 = vmatpush.msk.msra.mxu0 %vm727_vm4, %v1615_v3  ;;  %v821_v16 = vmin.f32 %v817_v7, %v1943_v1  ;;  %v2026_v13 = vsel %vm719_vm14, 1e+30, %v1853_v8  ;;  %v2032_v18 = vsel %vm718_vm15, 1e+30, %v1835_v55  ;;  %v813_v19 = vsel %vm729_vm1, 1e+30, %v1897_v0 }
 0x13d   : > { %v820_v20 = vmin.f32 %v816_v38, %v1949_v2  ;;  %v815_v15 = vmin.f32 %v2017_v11, %v2026_v13  ;;  %v818_v21 = vmin.f32 %v2032_v18, %v1965_v4  ;;  %v812_v24 = vsel %vm728_vm2, 1e+30, %v691_v51  ;;  %v2106_v55 = vld [vmem:[%s2093_s24] sm:$0xf] }
 0x13e   : > { %1346 = vmatpush.msk.msra.mxu0 %vm726_vm3, %v1615_v3  ;;  %v825_v17 = vmin.f32 %v821_v16, %v813_v19  ;;  %v814_v28 = vsel %vm730_vm0, 1e+30, %v1902_v30  ;;  %v811_v29 = vsel %vm727_vm4, 1e+30, %v690_v41 }
 0x13f   : > { %v824_v22 = vmin.f32 %v820_v20, %v812_v24  ;;  %v819_v47 = vmin.f32 %v815_v15, %v1959_v43  ;;  %v822_v0 = vmin.f32 %v818_v21, %v1929_v63 }
 0x140   : > { %1347 = vmatpush.msk.msra.mxu0 %vm725_vm5, %v1615_v3 }
 0x141   : > { %v823_v31 = vmin.f32 %v819_v47, %v811_v29  ;;  %v826_v5 = vmin.f32 %v822_v0, %v814_v28 }
 0x142   : > { %1348 = vmatpush.msk.msra.mxu0 %vm724_vm6, %v1615_v3 }
 0x143   : > { %v827_v32 = vmin.f32 %v823_v31, %v824_v22  ;;  %v828_v25 = vmin.f32 %v825_v17, %v826_v5 }
 0x144   : > { %1349 = vmatpush.msk.msra.mxu0 %vm723_vm7, %v1615_v3 }
 0x145   : > { %v829_v30 = vmin.f32 %v827_v32, %v828_v25 }
 0x146   : > { %1350 = vmatpush.msk.msra.mxu0 %vm722_vm8, %v1615_v3 }
 0x147   : > { %v830_v42 = vrot.slane %v829_v30, 4 }
 0x148   : > { %1351 = vmatpush.msk.msra.mxu0 %vm721_vm10, %v1615_v3 }
 0x149   : > { %v831_v61 = vmin.f32 %v829_v30, %v830_v42 }
 0x14a   : > { %1352 = vmatpush.msk.msra.mxu0 %vm720_vm12, %v1615_v3 }
 0x14b   : > { %v832_v54 = vrot.slane %v831_v61, 2 }
 0x14c   : > { %1353 = vmatpush.msk.msra.mxu0 %vm719_vm14, %v1615_v3 }
 0x14d   : > { %v833_v14 = vmin.f32 %v831_v61, %v832_v54 }
 0x14e   : > { %1354 = vmatpush.msk.msra.mxu0 %vm718_vm15, %v1615_v3 }
 0x14f   : > { %v834_v57 = vrot.slane %v833_v14, 1 }
 0x150   : > { %1355 = vmatpush.msk.msra.mxu0 %vm717_vm9, %v1615_v3 }
 0x151   : > { %v2099_v8 = vmin.f32 %v833_v14, %v834_v57 }
 0x152   : > { %1356 = vmatpush.msk.msra.mxu0 %vm716_vm11, %v1615_v3 }
 0x153   : > { %vm851_vm0 = vcmp.eq.f32.partialorder %v814_v28, %v2099_v8  ;;  %vm850_vm1 = vcmp.eq.f32.partialorder %v813_v19, %v2099_v8  ;;  %vm849_vm2 = vcmp.eq.f32.partialorder %v812_v24, %v2099_v8  ;;  %vm848_vm3 = vcmp.eq.f32.partialorder %v811_v29, %v2099_v8 }
 0x154   : > { %1357 = vmatpush.msk.msra.mxu0 %vm715_vm13, %v1615_v3  ;;  %1358 = vmatpush.msk.msra.mxu1 %vm851_vm0, %v1615_v3  ;;  %v2117_v26 = vsel %vm851_vm0, 1e+30, %v814_v28  ;;  %v2119_v58 = vsel %vm850_vm1, 1e+30, %v813_v19  ;;  %v2123_v59 = vsel %vm849_vm2, 1e+30, %v812_v24  ;;  %vm847_vm4 = vcmp.eq.f32.partialorder %v1929_v63, %v2099_v8 }
 0x155   : > { %763 = vmatmul.f32.vlgmr.msra.gmra.mxu0 %v2106_v55  ;;  %v2130_v12 = vsel %vm848_vm3, 1e+30, %v811_v29  ;;  %v2136_v33 = vsel %vm847_vm4, 1e+30, %v1929_v63  ;;  %vm846_vm5 = vcmp.eq.f32.partialorder %v1943_v1, %v2099_v8  ;;  %vm845_vm6 = vcmp.eq.f32.partialorder %v1949_v2, %v2099_v8 }
 0x156   : > { %1359 = vmatpush.msk.msra.mxu1 %vm850_vm1, %v1615_v3  ;;  %v2147_v23 = vsel %vm846_vm5, 1e+30, %v1943_v1  ;;  %v2153_v27 = vsel %vm845_vm6, 1e+30, %v1949_v2  ;;  %vm844_vm7 = vcmp.eq.f32.partialorder %v1959_v43, %v2099_v8  ;;  %vm843_vm8 = vcmp.eq.f32.partialorder %v1965_v4, %v2099_v8 }
 0x157   : > { %v2163_v36 = vsel %vm844_vm7, 1e+30, %v1959_v43  ;;  %v2169_v35 = vsel %vm843_vm8, 1e+30, %v1965_v4  ;;  %vm838_vm9 = vcmp.eq.f32.partialorder %v1978_v45, %v2099_v8  ;;  %vm842_vm10 = vcmp.eq.f32.partialorder %v1984_v6, %v2099_v8 }
 0x158   : > { %1360 = vmatpush.msk.msra.mxu1 %vm849_vm2, %v1615_v3  ;;  %v2182_v56 = vsel %vm838_vm9, 1e+30, %v1978_v45  ;;  %v2188_v37 = vsel %vm842_vm10, 1e+30, %v1984_v6  ;;  %vm837_vm11 = vcmp.eq.f32.partialorder %v1996_v9, %v2099_v8  ;;  %vm841_vm12 = vcmp.eq.f32.partialorder %v2002_v10, %v2099_v8 }
 0x159   : > { %v938_v39 = vmin.f32 %v2182_v56, %v2188_v37  ;;  %v2200_v40 = vsel %vm837_vm11, 1e+30, %v1996_v9  ;;  %v2206_v41 = vsel %vm841_vm12, 1e+30, %v2002_v10  ;;  %vm836_vm13 = vcmp.eq.f32.partialorder %v2017_v11, %v2099_v8 }
 0x15a   : > { %1361 = vmatpush.msk.msra.mxu1 %vm848_vm3, %v1615_v3  ;;  %v937_v51 = vmin.f32 %v2200_v40, %v2206_v41  ;;  %vm840_vm14 = vcmp.eq.f32.partialorder %v2026_v13, %v2099_v8  ;;  %v2221_v44 = vsel %vm836_vm13, 1e+30, %v2017_v11  ;;  %vm839_vm15 = vcmp.eq.f32.partialorder %v2032_v18, %v2099_v8 }
 0x15b   : > { %v942_v46 = vmin.f32 %v938_v39, %v2147_v23  ;;  %v2230_v48 = vsel %vm840_vm14, 1e+30, %v2026_v13  ;;  %v2236_v60 = vsel %vm839_vm15, 1e+30, %v2032_v18 }
 0x15c   : > { %1362 = vmatpush.msk.msra.mxu1 %vm847_vm4, %v1615_v3  ;;  %v941_v49 = vmin.f32 %v937_v51, %v2153_v27  ;;  %v936_v50 = vmin.f32 %v2221_v44, %v2230_v48  ;;  %v939_v52 = vmin.f32 %v2236_v60, %v2169_v35 }
 0x15d   : > { %v946_v53 = vmin.f32 %v942_v46, %v2119_v58 }
 0x15e   : > { %1363 = vmatpush.msk.msra.mxu1 %vm846_vm5, %v1615_v3  ;;  %v945_v62 = vmin.f32 %v941_v49, %v2123_v59  ;;  %v940_v63 = vmin.f32 %v936_v50, %v2163_v36  ;;  %v943_v7 = vmin.f32 %v939_v52, %v2136_v33 }
 0x160   : > { %1364 = vmatpush.msk.msra.mxu1 %vm845_vm6, %v1615_v3  ;;  %v944_v38 = vmin.f32 %v940_v63, %v2130_v12  ;;  %v947_v16 = vmin.f32 %v943_v7, %v2117_v26 }
 0x162   : > { %1365 = vmatpush.msk.msra.mxu1 %vm844_vm7, %v1615_v3  ;;  %v948_v1 = vmin.f32 %v944_v38, %v945_v62  ;;  %v949_v19 = vmin.f32 %v946_v53, %v947_v16 }
 0x164   : > { %1366 = vmatpush.msk.msra.mxu1 %vm843_vm8, %v1615_v3  ;;  %v950_v20 = vmin.f32 %v948_v1, %v949_v19 }
 0x166   : > { %1367 = vmatpush.msk.msra.mxu1 %vm842_vm10, %v1615_v3  ;;  %v951_v2 = vrot.slane %v950_v20, 4 }
 0x168   : > { %1368 = vmatpush.msk.msra.mxu1 %vm841_vm12, %v1615_v3  ;;  %v952_v43 = vmin.f32 %v950_v20, %v951_v2 }
 0x16a   : > { %1369 = vmatpush.msk.msra.mxu1 %vm840_vm14, %v1615_v3  ;;  %v953_v4 = vrot.slane %v952_v43, 2 }
 0x16c   : > { %1370 = vmatpush.msk.msra.mxu1 %vm839_vm15, %v1615_v3  ;;  %v954_v6 = vmin.f32 %v952_v43, %v953_v4 }
 0x16e   : > { %v955_v15 = vrot.slane %v954_v6, 1  ;;  %1371 = vmatpush.msk.msra.mxu1 %vm838_vm9, %v1615_v3 }
 0x170   : > { %v2289_v10 = vmin.f32 %v954_v6, %v955_v15  ;;  %1372 = vmatpush.msk.msra.mxu1 %vm837_vm11, %v1615_v3 }
 0x172   : > { %vm972_vm0 = vcmp.eq.f32.partialorder %v2117_v26, %v2289_v10  ;;  %vm971_vm1 = vcmp.eq.f32.partialorder %v2119_v58, %v2289_v10  ;;  %vm970_vm2 = vcmp.eq.f32.partialorder %v2123_v59, %v2289_v10  ;;  %1373 = vmatpush.msk.msra.mxu1 %vm836_vm13, %v1615_v3  ;;  %vm969_vm3 = vcmp.eq.f32.partialorder %v2130_v12, %v2289_v10 }
 0x173   : > { %1374 = vmatpush.msk.msra.mxu2 %vm972_vm0, %v1615_v3  ;;  %v2312_v45 = vsel %vm971_vm1, 1e+30, %v2119_v58  ;;  %v2318_v9 = vsel %vm970_vm2, 1e+30, %v2123_v59  ;;  %v2324_v11 = vsel %vm969_vm3, 1e+30, %v2130_v12  ;;  %884 = vmatmul.f32.vlgmr.msra.gmra.mxu1 %v2106_v55  ;;  %vm968_vm4 = vcmp.eq.f32.partialorder %v2136_v33, %v2289_v10 }
 0x174   : > { %v2333_v13 = vsel %vm968_vm4, 1e+30, %v2136_v33  ;;  %vm967_vm5 = vcmp.eq.f32.partialorder %v2147_v23, %v2289_v10  ;;  %vm966_vm6 = vcmp.eq.f32.partialorder %v2153_v27, %v2289_v10  ;;  %vm965_vm7 = vcmp.eq.f32.partialorder %v2163_v36, %v2289_v10 }
 0x175   : > { %1375 = vmatpush.msk.msra.mxu2 %vm971_vm1, %v1615_v3  ;;  %v2346_v18 = vsel %vm967_vm5, 1e+30, %v2147_v23  ;;  %v2352_v21 = vsel %vm966_vm6, 1e+30, %v2153_v27  ;;  %v2358_v24 = vsel %vm965_vm7, 1e+30, %v2163_v36  ;;  %vm964_vm8 = vcmp.eq.f32.partialorder %v2169_v35, %v2289_v10 }
 0x176   : > { %v2366_v17 = vsel %vm964_vm8, 1e+30, %v2169_v35  ;;  %vm959_vm9 = vcmp.eq.f32.partialorder %v2182_v56, %v2289_v10  ;;  %vm963_vm10 = vcmp.eq.f32.partialorder %v2188_v37, %v2289_v10  ;;  %vm958_vm11 = vcmp.eq.f32.partialorder %v2200_v40, %v2289_v10 }
 0x177   : > { %1376 = vmatpush.msk.msra.mxu2 %vm970_vm2, %v1615_v3  ;;  %v2382_v22 = vsel %vm959_vm9, 1e+30, %v2182_v56  ;;  %v2388_v47 = vsel %vm963_vm10, 1e+30, %v2188_v37  ;;  %vm962_vm12 = vcmp.eq.f32.partialorder %v2206_v41, %v2289_v10  ;;  %v2396_v0 = vsel %vm958_vm11, 1e+30, %v2200_v40 }
 0x178   : > { %v1059_v28 = vmin.f32 %v2382_v22, %v2388_v47  ;;  %v2404_v29 = vsel %vm962_vm12, 1e+30, %v2206_v41  ;;  %vm957_vm13 = vcmp.eq.f32.partialorder %v2221_v44, %v2289_v10  ;;  %vm961_vm14 = vcmp.eq.f32.partialorder %v2230_v48, %v2289_v10 }
 0x179   : > { %1377 = vmatpush.msk.msra.mxu2 %vm969_vm3, %v1615_v3  ;;  %v1058_v31 = vmin.f32 %v2396_v0, %v2404_v29  ;;  %v2420_v5 = vsel %vm957_vm13, 1e+30, %v2221_v44  ;;  %v2426_v32 = vsel %vm961_vm14, 1e+30, %v2230_v48  ;;  %vm960_vm15 = vcmp.eq.f32.partialorder %v2236_v60, %v2289_v10 }
 0x17a   : > { %v1063_v25 = vmin.f32 %v1059_v28, %v2346_v18  ;;  %v1057_v30 = vmin.f32 %v2420_v5, %v2426_v32  ;;  %v1044_v42 = vsel %vm960_vm15, 1e+30, %v2236_v60  ;;  %v1056_v61 = vsel %vm972_vm0, 1e+30, %v2117_v26 }
 0x17b   : > { %1378 = vmatpush.msk.msra.mxu2 %vm968_vm4, %v1615_v3  ;;  %v1062_v54 = vmin.f32 %v1058_v31, %v2352_v21  ;;  %v1060_v14 = vmin.f32 %v1044_v42, %v2366_v17 }
 0x17c   : > { %v1067_v57 = vmin.f32 %v1063_v25, %v2312_v45  ;;  %v1061_v58 = vmin.f32 %v1057_v30, %v2358_v24 }
 0x17d   : > { %1379 = vmatpush.msk.msra.mxu2 %vm967_vm5, %v1615_v3  ;;  %v1066_v26 = vmin.f32 %v1062_v54, %v2318_v9  ;;  %v1064_v59 = vmin.f32 %v1060_v14, %v2333_v13 }
 0x17e   : > { %v1065_v12 = vmin.f32 %v1061_v58, %v2324_v11 }
 0x17f   : > { %1380 = vmatpush.msk.msra.mxu2 %vm966_vm6, %v1615_v3  ;;  %v1068_v33 = vmin.f32 %v1064_v59, %v1056_v61 }
 0x180   : > { %v1069_v39 = vmin.f32 %v1065_v12, %v1066_v26 }
 0x181   : > { %1381 = vmatpush.msk.msra.mxu2 %vm965_vm7, %v1615_v3  ;;  %v1070_v23 = vmin.f32 %v1067_v57, %v1068_v33 }
 0x183   : > { %1382 = vmatpush.msk.msra.mxu2 %vm964_vm8, %v1615_v3  ;;  %v1071_v51 = vmin.f32 %v1069_v39, %v1070_v23  ;;  %v344_v23 = vld [vmem:[%s320_s29] sm:$0x7] }
 0x185   : > { %1383 = vmatpush.msk.msra.mxu2 %vm963_vm10, %v1615_v3  ;;  %v1072_v27 = vrot.slane %v1071_v51, 4 }
 0x187   : > { %1384 = vmatpush.msk.msra.mxu2 %vm962_vm12, %v1615_v3  ;;  %v1073_v36 = vmin.f32 %v1071_v51, %v1072_v27 }
 0x189   : > { %1385 = vmatpush.msk.msra.mxu2 %vm961_vm14, %v1615_v3  ;;  %v1074_v35 = vrot.slane %v1073_v36, 2 }
 0x18b   : > { %1386 = vmatpush.msk.msra.mxu2 %vm960_vm15, %v1615_v3  ;;  %v1075_v37 = vmin.f32 %v1073_v36, %v1074_v35 }
 0x18d   : > { %v1076_v46 = vrot.slane %v1075_v37, 1  ;;  %1387 = vmatpush.msk.msra.mxu2 %vm959_vm9, %v1615_v3 }
 0x18f   : > { %v2488_v41 = vmin.f32 %v1075_v37, %v1076_v46  ;;  %1388 = vmatpush.msk.msra.mxu2 %vm958_vm11, %v1615_v3 }
 0x191   : > { %vm1093_vm0 = vcmp.eq.f32.partialorder %v1056_v61, %v2488_v41  ;;  %vm1092_vm1 = vcmp.eq.f32.partialorder %v2312_v45, %v2488_v41  ;;  %vm1091_vm2 = vcmp.eq.f32.partialorder %v2318_v9, %v2488_v41  ;;  %1389 = vmatpush.msk.msra.mxu2 %vm957_vm13, %v1615_v3  ;;  %vm1090_vm3 = vcmp.eq.f32.partialorder %v2324_v11, %v2488_v41 }
 0x192   : > { %1390 = vmatpush.msk.msra.mxu3 %vm1093_vm0, %v1615_v3  ;;  %1005 = vmatmul.f32.vlgmr.msra.gmra.mxu2 %v2106_v55  ;;  %vm1089_vm4 = vcmp.eq.f32.partialorder %v2333_v13, %v2488_v41  ;;  %vm1088_vm5 = vcmp.eq.f32.partialorder %v2346_v18, %v2488_v41  ;;  %vm1087_vm6 = vcmp.eq.f32.partialorder %v2352_v21, %v2488_v41 }
 0x193   : > { %vm1086_vm7 = vcmp.eq.f32.partialorder %v2358_v24, %v2488_v41  ;;  %vm1085_vm8 = vcmp.eq.f32.partialorder %v2366_v17, %v2488_v41  ;;  %vm1084_vm9 = vcmp.eq.f32.partialorder %v2388_v47, %v2488_v41  ;;  %vm1083_vm10 = vcmp.eq.f32.partialorder %v2404_v29, %v2488_v41 }
 0x194   : > { %1391 = vmatpush.msk.msra.mxu3 %vm1092_vm1, %v1615_v3  ;;  %vm1082_vm11 = vcmp.eq.f32.partialorder %v2426_v32, %v2488_v41  ;;  %vm1081_vm12 = vcmp.eq.f32.partialorder %v1044_v42, %v2488_v41  ;;  %vm1080_vm13 = vcmp.eq.f32.partialorder %v2382_v22, %v2488_v41  ;;  %vm1079_vm14 = vcmp.eq.f32.partialorder %v2396_v0, %v2488_v41 }
 0x195   : > { %vm1078_vm15 = vcmp.eq.f32.partialorder %v2420_v5, %v2488_v41 }
 0x196   : > { %1392 = vmatpush.msk.msra.mxu3 %vm1091_vm2, %v1615_v3 }
 0x198   : > { %1393 = vmatpush.msk.msra.mxu3 %vm1090_vm3, %v1615_v3 }
 0x19a   : > { %1394 = vmatpush.msk.msra.mxu3 %vm1089_vm4, %v1615_v3  ;;  %vm796_vm4 = vcmp.le.f32.partialorder %v1911_v34, 100.0 }
 0x19c   : > { %1395 = vmatpush.msk.msra.mxu3 %vm1088_vm5, %v1615_v3 }
 0x19e   : > { %1396 = vmatpush.msk.msra.mxu3 %vm1087_vm6, %v1615_v3 }
 0x1a0   : > { %1397 = vmatpush.msk.msra.mxu3 %vm1086_vm7, %v1615_v3 }
 0x1a2   : > { %1398 = vmatpush.msk.msra.mxu3 %vm1085_vm8, %v1615_v3 }
 0x1a4   : > { %1399 = vmatpush.msk.msra.mxu3 %vm1084_vm9, %v1615_v3  ;;  %vm917_vm9 = vcmp.le.f32.partialorder %v2099_v8, 100.0 }
 0x1a6   : > { %1400 = vmatpush.msk.msra.mxu3 %vm1083_vm10, %v1615_v3 }
 0x1a8   : > { %1401 = vmatpush.msk.msra.mxu3 %vm1082_vm11, %v1615_v3 }
 0x1aa   : > { %1402 = vmatpush.msk.msra.mxu3 %vm1081_vm12, %v1615_v3 }
 0x1ac   : > { %1403 = vmatpush.msk.msra.mxu3 %vm1080_vm13, %v1615_v3 }
 0x1ae   : > { %1404 = vmatpush.msk.msra.mxu3 %vm1079_vm14, %v1615_v3 }
 0x1b0   : > { %1405 = vmatpush.msk.msra.mxu3 %vm1078_vm15, %v1615_v3 }
 0x1b1   : > { %1126 = vmatmul.f32.vlgmr.msra.gmra.mxu3 %v2106_v55  ;;  %v2553_v55 = vld [vmem:[%s2093_s24 + $0x1] sm:$0x7] }
 0x1b2   : > { %v345_v36 = vsub.f32 %v2553_v55, %v344_v23 }
 0x1b4   : > { %v346_v46 = vand.u32 2147483647, %v345_v36 }
 0x1d2   : > { %v764_v56 = vpop.f32.mrf.mxu0 }
 0x1d3   : > { %1492 = vrcp.f32 %v764_v56  ;;  %v778_v48 = vand.u32 2147483648, %v764_v56  ;;  %vm772_vm0 = vweird.f32 %v764_v56  ;;  %v776_v49 = vand.u32 2147483647, %v764_v56 }
 0x1d5   : > { %v779_v52 = vor.u32 1.1754944e-38, %v778_v48  ;;  %vm777_vm3 = vcmp.eq.f32.partialorder %v776_v49, 8.507059e+37 }
 0x1d9   : > { %v1493_v40 = vpop.eup %1492 }
 0x1da   : > { %v768_v44 = vmul.f32 %v1493_v40, %v764_v56  ;;  %vm773_vm1 = vweird.f32 %v1493_v40 }
 0x1db   : > { %vm774_vm2 = vmor %vm772_vm0, %vm773_vm1 }
 0x1dc   : > { %v769_v60 = vsub.f32 1.0, %v768_v44  ;;  %v351_v44 = vrot.slane %v346_v46, 2 }
 0x1de   : > { %v770_v50 = vmul.f32 %v1493_v40, %v769_v60 }
 0x1e0   : > { %v771_v53 = vadd.f32 %v1493_v40, %v770_v50 }
 0x1e2   : > { %v775_v62 = vsel %vm774_vm2, %v1493_v40, %v771_v53  ;;  %v348_v40 = vrot.slane %v346_v46, 1 }
 0x1e3   : > { %v780_v63 = vsel %vm777_vm3, %v779_v52, %v775_v62 }
 0x1e4   : > { %v782_v3 = vperm.slane %v780_v63, 0  ;;  %v350_v60 = vadd.f32 %v348_v40, %v346_v46 }
 0x1e6   : > { %v783_v7 = vmul.f32 %v782_v3, %v764_v56  ;;  %v353_v53 = vadd.f32 %v351_v44, %v350_v60 }
 0x1e8   : > { %v785_v38 = vrot.slane %v783_v7, 1  ;;  %354 = vst [vmem:[%s291_s11] sm:$0x1] %v353_v53 }
 0x1ea   : > { %v787_v16 = vsub.f32 %v2553_v55, %v785_v38 }
 0x1ec   : > { %v788_v1 = vand.u32 2147483647, %v787_v16 }
 0x1ee   : > { %v790_v19 = vrot.slane %v788_v1, 1  ;;  %v793_v20 = vrot.slane %v788_v1, 2 }
 0x1f0   : > { %v792_v2 = vadd.f32 %v790_v19, %v788_v1  ;;  %v885_v43 = vpop.f32.mrf.mxu1 }
 0x1f1   : > { %1494 = vrcp.f32 %v885_v43  ;;  %v899_v9 = vand.u32 2147483648, %v885_v43  ;;  %vm893_vm5 = vweird.f32 %v885_v43  ;;  %v897_v13 = vand.u32 2147483647, %v885_v43 }
 0x1f2   : > { %v795_v4 = vadd.f32 %v793_v20, %v792_v2 }
 0x1f3   : > { %v900_v21 = vor.u32 1.1754944e-38, %v899_v9  ;;  %vm898_vm8 = vcmp.eq.f32.partialorder %v897_v13, 8.507059e+37 }
 0x1f4   : > { %v797_v6 = vsel %vm796_vm4, %v795_v4, 0.0 }
 0x1f7   : > { %v1495_v15 = vpop.eup %1494 }
 0x1f8   : > { %v889_v45 = vmul.f32 %v1495_v15, %v885_v43  ;;  %vm894_vm6 = vweird.f32 %v1495_v15 }
 0x1f9   : > { %vm895_vm7 = vmor %vm893_vm5, %vm894_vm6 }
 0x1fa   : > { %v890_v11 = vsub.f32 1.0, %v889_v45 }
 0x1fc   : > { %v891_v18 = vmul.f32 %v1495_v15, %v890_v11 }
 0x1fe   : > { %v892_v24 = vadd.f32 %v1495_v15, %v891_v18 }
 0x200   : > { %v896_v17 = vsel %vm895_vm7, %v1495_v15, %v892_v24 }
 0x201   : > { %v901_v22 = vsel %vm898_vm8, %v900_v21, %v896_v17 }
 0x202   : > { %v903_v47 = vperm.slane %v901_v22, 0 }
 0x204   : > { %v904_v0 = vmul.f32 %v903_v47, %v885_v43 }
 0x206   : > { %v906_v28 = vrot.slane %v904_v0, 1 }
 0x208   : > { %v908_v34 = vsub.f32 %v2553_v55, %v906_v28 }
 0x20a   : > { %v909_v29 = vand.u32 2147483647, %v908_v34 }
 0x20c   : > { %v911_v31 = vrot.slane %v909_v29, 1  ;;  %v914_v5 = vrot.slane %v909_v29, 2 }
 0x20e   : > { %v913_v32 = vadd.f32 %v911_v31, %v909_v29 }
 0x210   : > { %v916_v25 = vadd.f32 %v914_v5, %v913_v32 }
 0x212   : > { %v918_v30 = vsel %vm917_vm9, %v916_v25, 0.0 }
 0x213   : > { %v919_v42 = vadd.f32 %v918_v30, %v797_v6 }
 0x215   : > { %v1006_v61 = vpop.f32.mrf.mxu2 }
 0x216   : > { %1496 = vrcp.f32 %v1006_v61  ;;  %v1020_v57 = vand.u32 2147483648, %v1006_v61  ;;  %vm1014_vm10 = vweird.f32 %v1006_v61  ;;  %v1018_v26 = vand.u32 2147483647, %v1006_v61 }
 0x218   : > { %v1021_v12 = vor.u32 1.1754944e-38, %v1020_v57  ;;  %vm1019_vm13 = vcmp.eq.f32.partialorder %v1018_v26, 8.507059e+37 }
 0x21c   : > { %v1497_v54 = vpop.eup %1496 }
 0x21d   : > { %v1010_v14 = vmul.f32 %v1497_v54, %v1006_v61  ;;  %vm1015_vm11 = vweird.f32 %v1497_v54 }
 0x21e   : > { %vm1016_vm12 = vmor %vm1014_vm10, %vm1015_vm11 }
 0x21f   : > { %v1011_v58 = vsub.f32 1.0, %v1010_v14 }
 0x221   : > { %v1012_v59 = vmul.f32 %v1497_v54, %v1011_v58 }
 0x223   : > { %v1013_v33 = vadd.f32 %v1497_v54, %v1012_v59 }
 0x225   : > { %v1017_v8 = vsel %vm1016_vm12, %v1497_v54, %v1013_v33 }
 0x226   : > { %v1022_v39 = vsel %vm1019_vm13, %v1021_v12, %v1017_v8 }
 0x227   : > { %v1024_v51 = vperm.slane %v1022_v39, 0 }
 0x229   : > { %v1025_v27 = vmul.f32 %v1024_v51, %v1006_v61 }
 0x22b   : > { %v1027_v35 = vrot.slane %v1025_v27, 1 }
 0x22d   : > { %v1029_v37 = vsub.f32 %v2553_v55, %v1027_v35 }
 0x22f   : > { %v1030_v56 = vand.u32 2147483647, %v1029_v37 }
 0x231   : > { %v1032_v48 = vrot.slane %v1030_v56, 1  ;;  %v1035_v49 = vrot.slane %v1030_v56, 2 }
 0x233   : > { %v1034_v50 = vadd.f32 %v1032_v48, %v1030_v56 }
 0x234   : > { %v1127_v52 = vpop.f32.mrf.mxu3 }
 0x235   : > { %1498 = vrcp.f32 %v1127_v52  ;;  %v1037_v62 = vadd.f32 %v1035_v49, %v1034_v50 }
 0x236   : > { %1527 = shalt.err (!%p1524_p5)
}
 0x237   : > { %1409 = dma.vmem_to_hbm [thread:$0]  (%p1686_p4), %s1181_s12, 16, %s1183_s13, %s1165_s14   ;;  %vm1038_vm14 = vcmp.le.f32.partialorder %v2289_v10, 100.0  ;;  %v1141_v1 = vand.u32 2147483648, %v1127_v52  ;;  %v1139_v20 = vand.u32 2147483647, %v1127_v52  ;;  %vm1135_vm0 = vweird.f32 %v1127_v52 }
 0x238   : > { %v1039_v63 = vsel %vm1038_vm14, %v1037_v62, 0.0  ;;  %s1192_s10 = scalar_lea.hbm %s2630_s5, %s1602_s21  ;;  %vm1159_vm3 = vcmp.le.f32.partialorder %v2488_v41, 100.0  ;;  %s297_s11 = scalar_lea.vmem [#allocation4], %s2565_s7 }
 0x239   : > { %v1040_v3 = vadd.f32 %v1039_v63, %v919_v42  ;;  %v1142_v43 = vor.u32 1.1754944e-38, %v1141_v1  ;;  %vm1140_vm2 = vcmp.eq.f32.partialorder %v1139_v20, 8.507059e+37  ;;  %s1194_s12 = sshll.u32 %s297_s11, 4  ;;  %s1196_s13 = sshll.u32 %s1192_s10, 4  ;;  %s1195_s12 = int_to_ptr.vmem [resolvable:$true] %s1194_s12  ;;  %s1197_s13 = int_to_ptr.hbm [resolvable:$true] %s1196_s13 }
 0x23a   : > { %s1169_s14 = scalar_lea.sflag [#allocation5], %s2565_s7  ;;  %s1542_s15 = sshra.s32 %s1197_s13, 4  ;;  %s1543_s15 = int_to_ptr.hbm [resolvable:$true] %s1542_s15 }
 0x23b   : > { %v1499_v7 = vpop.eup %1498  ;;  %s1544_s16 = scalar_lea.hbm %s1543_s15, 1  ;;  %s1548_s24 = scalar_lea.hbm %s2630_s5, 2 }
 0x23c   : > { %v1131_v38 = vmul.f32 %v1499_v7, %v1127_v52  ;;  %vm1136_vm15 = vweird.f32 %v1499_v7  ;;  %p1545_p6 = scmp.ne.s32.totalorder %s1543_s15, %s1544_s16  ;;  %p1549_p10 = scmp.lt.s32.totalorder %s1543_s15, %s2630_s5 }
 0x23d   : > { %vm1137_vm1 = vmor %vm1135_vm0, %vm1136_vm15  ;;  %p1550_p11 = scmp.lt.s32.totalorder %s1548_s24, %s1544_s16 }
 0x23e   : > { %v1132_v16 = vsub.f32 1.0, %v1131_v38  ;;  %p1546_p7 = pnand %p1545_p6, %p1686_p4 }
 0x23f   : > { %p1551_p12 = por %p1550_p11, %p1549_p10 }
 0x240   : > { %v1133_v19 = vmul.f32 %v1499_v7, %v1132_v16  ;;  %p1547_p9 = pneg %p1546_p7 }
 0x242   : > { %v1134_v2 = vadd.f32 %v1499_v7, %v1133_v19  ;;  %p1552_p13 = pnand %p1551_p12, %p1547_p9 }
 0x244   : > { %v1138_v4 = vsel %vm1137_vm1, %v1499_v7, %v1134_v2 }
 0x245   : > { %v1143_v6 = vsel %vm1140_vm2, %v1142_v43, %v1138_v4 }
 0x246   : > { %v1145_v15 = vperm.slane %v1143_v6, 0 }
 0x248   : > { %v1146_v10 = vmul.f32 %v1145_v15, %v1127_v52 }
 0x24a   : > { %v1148_v45 = vrot.slane %v1146_v10, 1 }
 0x24c   : > { %v1150_v9 = vsub.f32 %v2553_v55, %v1148_v45 }
 0x24e   : > { %v1151_v11 = vand.u32 2147483647, %v1150_v9 }
 0x250   : > { %v1153_v13 = vrot.slane %v1151_v11, 1  ;;  %v1156_v21 = vrot.slane %v1151_v11, 2 }
 0x252   : > { %v1155_v18 = vadd.f32 %v1153_v13, %v1151_v11 }
 0x254   : > { %v1158_v24 = vadd.f32 %v1156_v21, %v1155_v18 }
 0x256   : > { %v1160_v17 = vsel %vm1159_vm3, %v1158_v24, 0.0 }
 0x257   : > { %v1161_v22 = vadd.f32 %v1160_v17, %v1040_v3 }
 0x259   : > { %v1162_v47 = vmul.f32 0.25, %v1161_v22 }
 0x25b   : > { %1163 = vst [vmem:[%s297_s11] sm:$0x1] %v1162_v47 }
 0x25c   : > { %1555 = shalt.err (!%p1552_p13)
}
 0x25d   : > { %1410 = dma.vmem_to_hbm [thread:$0]  (%p1686_p4), %s1195_s12, 16, %s1197_s13, %s1169_s14  }
 0x25e PF: > { %p1420_p0 = scmp.ge.s32.totalorder %s1610_s23, 2  ;;  %s1208_s7 = sand.u32 1, %s1590_s18  }
 0x25f   : > { %s1209_s29 = scalar_lea.sflag [#allocation3], %s1208_s7 }
 0x260   : > { %p1414_p1 = pnand %p1420_p0, %p1693_p8 }
 0x262   : > { %p1415_p2 = pneg %p1414_p1 }
 0x264   : > { %1581 = dma.done.wait (%p1415_p2), %s1209_s29, 16  }
 0x265   : > { %1583 = vsyncadd (%p1415_p2), %s1209_s29, 4294967280  ;;  %s1218_s8 = scalar_lea.sflag [#allocation5], %s1208_s7 }
 0x266   : > { %1585 = dma.done.wait (%p1415_p2), %s1218_s8, 16  }
 0x267   : > { %1587 = vsyncadd (%p1415_p2), %s1218_s8, 4294967280  ;;  %s22_s23 = sadd.s32 1, %s1610_s23   ;;  %s2633_s18 = smov %s1594_s19 }
 0x268   : > { %p19_p3 = scmp.ge.s32.totalorder %s22_s23, 4   ;;  %s2634_s19 = smov %s1598_s20 }
 0x269   : > { %s2635_s20 = smov %s1699_s6  ;;  %s2636_s21 = smov %s1606_s22 }
 0x26a   : > { %s2637_s22 = smov %s2639_s26  ;;  %21 = sbr.rel (!%p19_p3) target bundleno = 6 (0x6), region = 98 }
 0x26f   :  { %1223 = vsyncpa [#allocation3], 1 }
 0x270   :  { %1225 = vsyncpa [#allocation3 + $0x1], 1 }
 0x271   :  { %1226 = vsyncpa [#allocation5], 1 }
 0x272   :  { %1228 = vsyncpa [#allocation5 + $0x1], 1 }

</bundles_post_ra>
